<compile_context>
chip_gen: v7x
topology: tpu7x:2x2x1
jax: 0.10.0
libtpu: 0.0.40
codegen_flags: <defaults>
</compile_context>

<pallas_src>
import jax
import jax.numpy as jnp
from jax import lax
from jax.experimental import pallas as pl
from jax.experimental.pallas import tpu as pltpu


def lstm_last_hidden_kernel(x_ref, wih_ref, whh_ref, b_ref, h_out_ref, gx_ref):
    """Single-invocation LSTM over the full sequence.

    x_ref   : (S, B_pad, E)  embedded tokens, time-major
    wih_ref : (4, E, H)      per-gate input->hidden weights [i, f, g, o]
    whh_ref : (4, H, H)      per-gate hidden->hidden weights [i, f, g, o]
    b_ref   : (4, 1, H)      per-gate combined bias (b_ih + b_hh)
    h_out_ref : (B_pad, H)   h_T (last hidden state)
    gx_ref  : (4, S, B_pad, H) VMEM scratch holding the hoisted input projection
    """
    S, Bp, E = x_ref.shape
    H = whh_ref.shape[-1]

    # (S, Bp, E) -> (S*Bp, E): merges the leading dim into sublanes
    # (Bp is a multiple of 8, so this is layout-preserving / free).
    x_flat = x_ref[...].reshape(S * Bp, E)

    # Hoisted input projection: one (S*Bp, E) x (E, H) matmul per gate,
    # entirely outside the sequential recurrence. Stored time-major so the
    # per-step read below is a plain tile-offset load.
    for k in range(4):
        gx_ref[k] = (
            jnp.dot(x_flat, wih_ref[k], preferred_element_type=jnp.float32)
            + b_ref[k]
        ).reshape(S, Bp, H)

    def step(t, carry):
        h, c = carry
        # Recurrent projection: four lane-aligned (Bp, H) slabs — no lane
        # slicing of a packed (Bp, 4H) gate vector.
        r_i = jnp.dot(h, whh_ref[0], preferred_element_type=jnp.float32)
        r_f = jnp.dot(h, whh_ref[1], preferred_element_type=jnp.float32)
        r_g = jnp.dot(h, whh_ref[2], preferred_element_type=jnp.float32)
        r_o = jnp.dot(h, whh_ref[3], preferred_element_type=jnp.float32)

        i_g = jax.nn.sigmoid(gx_ref[0, t] + r_i)
        f_g = jax.nn.sigmoid(gx_ref[1, t] + r_f)
        g_g = jnp.tanh(gx_ref[2, t] + r_g)
        o_g = jax.nn.sigmoid(gx_ref[3, t] + r_o)

        c_new = f_g * c + i_g * g_g
        h_new = o_g * jnp.tanh(c_new)
        return h_new, c_new

    h0 = jnp.zeros((Bp, H), jnp.float32)
    c0 = jnp.zeros((Bp, H), jnp.float32)
    # Short static trip count -> fully unroll so the LLO scheduler sees the
    # whole dependency chain; h/c stay in vregs across steps.
    h_last, _ = lax.fori_loop(0, S, step, (h0, c0), unroll=True)

    h_out_ref[...] = h_last


def simple_lstm_glove_forward(tokens, params):
    """tokens: int32 (B, S). Returns float32 (B,) — matches .squeeze(1) with O=1."""
    embed_w = params["embed"]   # (V, E)
    w_ih = params["w_ih"]       # (4, E, H)
    w_hh = params["w_hh"]       # (4, H, H)
    b = params["b"]             # (4, 1, H)
    w_fc = params["w_fc"]       # (H, O)
    b_fc = params["b_fc"]       # (O,)

    B, S = tokens.shape
    H = w_hh.shape[-1]
    O = w_fc.shape[1]

    # Pad batch to a sublane multiple; padded rows are computed on zero
    # embeddings and discarded afterwards.
    B_pad = ((B + 7) // 8) * 8
    tokens_p = jnp.pad(tokens, ((0, B_pad - B), (0, 0)))

    # Embedding gather emitted directly in time-major (S, B_pad, E) order —
    # only the tiny int token matrix is transposed, not the activations.
    x_tm = jnp.take(embed_w, tokens_p.T, axis=0).astype(jnp.float32)

    vmem = pl.BlockSpec(memory_space=pltpu.MemorySpace.VMEM)
    h_last_p = pl.pallas_call(
        lstm_last_hidden_kernel,
        out_shape=jax.ShapeDtypeStruct((B_pad, H), jnp.float32),
        in_specs=[vmem, vmem, vmem, vmem],
        out_specs=vmem,
        scratch_shapes=[pltpu.VMEM((4, S, B_pad, H), jnp.float32)],
    )(x_tm, w_ih, w_hh, b)

    h_last = h_last_p[:B]                              # (B, H)
    y = jax.nn.sigmoid(h_last @ w_fc + b_fc)           # (B, O) — trivial XLA op
    return y[:, 0] if O == 1 else y


# --------------------------------------------------------------------------
# Parameter handling: init in PyTorch layout, pack into the kernel layout.
# --------------------------------------------------------------------------
def init_torch_params(key, vocab_size, embedding_dim, hidden_dim, output_dim):
    ks = jax.random.split(key, 7)
    s = 0.1
    return {
        "embed": s * jax.random.normal(ks[0], (vocab_size, embedding_dim), jnp.float32),
        "W_ih": s * jax.random.normal(ks[1], (4 * hidden_dim, embedding_dim), jnp.float32),
        "W_hh": s * jax.random.normal(ks[2], (4 * hidden_dim, hidden_dim), jnp.float32),
        "b_ih": s * jax.random.normal(ks[3], (4 * hidden_dim,), jnp.float32),
        "b_hh": s * jax.random.normal(ks[4], (4 * hidden_dim,), jnp.float32),
        "W_fc": s * jax.random.normal(ks[5], (output_dim, hidden_dim), jnp.float32),
        "b_fc": s * jax.random.normal(ks[6], (output_dim,), jnp.float32),
    }


def pack_params(tp):
    """torch layout (W_ih:(4H,E), W_hh:(4H,H), b:(4H,)) -> per-gate transposed slabs."""
    H = tp["W_hh"].shape[1]
    w_ih = jnp.stack([tp["W_ih"][k * H:(k + 1) * H, :].T for k in range(4)])  # (4, E, H)
    w_hh = jnp.stack([tp["W_hh"][k * H:(k + 1) * H, :].T for k in range(4)])  # (4, H, H)
    b = (tp["b_ih"] + tp["b_hh"]).reshape(4, 1, H)                            # (4, 1, H)
    return {
        "embed": tp["embed"],
        "w_ih": w_ih,
        "w_hh": w_hh,
        "b": b,
        "w_fc": tp["W_fc"].T,   # (H, O)
        "b_fc": tp["b_fc"],     # (O,)
    }


def reference_forward(tokens, tp):
    """Pure-JAX reference using the PyTorch equations / layout (for validation)."""
    embed_w = tp["embed"]
    W_ih, W_hh, b_ih, b_hh = tp["W_ih"], tp["W_hh"], tp["b_ih"], tp["b_hh"]
    W_fc, b_fc = tp["W_fc"], tp["b_fc"]
    B, S = tokens.shape
    H = W_hh.shape[1]

    x = jnp.take(embed_w, tokens, axis=0)            # (B, S, E)
    h = jnp.zeros((B, H), jnp.float32)
    c = jnp.zeros((B, H), jnp.float32)
    for t in range(S):
        gates = x[:, t, :] @ W_ih.T + h @ W_hh.T + b_ih + b_hh   # (B, 4H)
        i_g = jax.nn.sigmoid(gates[:, 0:H])
        f_g = jax.nn.sigmoid(gates[:, H:2 * H])
        g_g = jnp.tanh(gates[:, 2 * H:3 * H])
        o_g = jax.nn.sigmoid(gates[:, 3 * H:4 * H])
        c = f_g * c + i_g * g_g
        h = o_g * jnp.tanh(c)
    y = jax.nn.sigmoid(h @ W_fc.T + b_fc)
    return y[:, 0]


if __name__ == "__main__":
    VOCAB, EMBED, HIDDEN, OUT = 50, 32, 32, 1
    B, S = 2, 8

    key = jax.random.PRNGKey(0)
    k_tok, k_par = jax.random.split(key)
    torch_params = init_torch_params(k_par, VOCAB, EMBED, HIDDEN, OUT)
    packed = pack_params(torch_params)
    tokens = jax.random.randint(k_tok, (B, S), 0, VOCAB, dtype=jnp.int32)

    fwd = jax.jit(simple_lstm_glove_forward)
    y = fwd(tokens, packed)
    y = jax.block_until_ready(y)

    y_ref = reference_forward(tokens, torch_params)
    assert y.shape == (B,)
    assert jnp.allclose(y, y_ref, atol=1e-5, rtol=1e-5), (y, y_ref)

    print("KERNEL_OK")
</pallas_src>

<mosaic_0001>
module attributes {stable_mosaic.version = 11 : i64} {
  func.func @lstm_last_hidden_kernel(%arg0: memref<8x8x32xf32, #tpu.memory_space<vmem>>, %arg1: memref<4x32x32xf32, #tpu.memory_space<vmem>>, %arg2: memref<4x32x32xf32, #tpu.memory_space<vmem>>, %arg3: memref<4x1x32xf32, #tpu.memory_space<vmem>>, %arg4: memref<8x32xf32, #tpu.memory_space<vmem>>, %arg5: memref<4x8x8x32xf32, #tpu.memory_space<vmem>>) attributes {dimension_semantics = [], scalar_prefetch = 0 : i64, scratch_operands = 1 : i64, tpu.core_type = #tpu.core_type<tc>} {
    %c0 = arith.constant 0 : index
    %c0_0 = arith.constant 0 : index
    %c0_1 = arith.constant 0 : index
    %0 = vector.load %arg0[%c0, %c0_0, %c0_1] : memref<8x8x32xf32, #tpu.memory_space<vmem>>, vector<8x8x32xf32>
    %1 = vector.shape_cast %0 : vector<8x8x32xf32> to vector<64x32xf32>
    %c0_2 = arith.constant 0 : index
    %c0_3 = arith.constant 0 : index
    %c0_4 = arith.constant 0 : index
    %2 = vector.load %arg1[%c0_2, %c0_3, %c0_4] : memref<4x32x32xf32, #tpu.memory_space<vmem>>, vector<1x32x32xf32>
    %3 = vector.shape_cast %2 : vector<1x32x32xf32> to vector<32x32xf32>
    %cst = arith.constant dense<0.000000e+00> : vector<64x32xf32>
    %4 = tpu.matmul %1, %3, %cst {dimension_numbers = #tpu.dot_dimension_numbers<[1], [0], [0], [1], [0, 0, 1, 1], [], []>} : vector<64x32xf32>, vector<32x32xf32>, vector<64x32xf32> -> vector<64x32xf32>
    %c0_5 = arith.constant 0 : index
    %c0_6 = arith.constant 0 : index
    %c0_7 = arith.constant 0 : index
    %5 = vector.load %arg3[%c0_5, %c0_6, %c0_7] : memref<4x1x32xf32, #tpu.memory_space<vmem>>, vector<1x1x32xf32>
    %6 = vector.shape_cast %5 : vector<1x1x32xf32> to vector<1x32xf32>
    %7 = vector.broadcast %6 : vector<1x32xf32> to vector<64x32xf32>
    %8 = arith.addf %4, %7 : vector<64x32xf32>
    %9 = vector.shape_cast %8 : vector<64x32xf32> to vector<8x8x32xf32>
    %c0_8 = arith.constant 0 : index
    %c0_9 = arith.constant 0 : index
    %c0_10 = arith.constant 0 : index
    %c0_11 = arith.constant 0 : index
    %10 = vector.load %arg5[%c0_8, %c0_9, %c0_10, %c0_11] : memref<4x8x8x32xf32, #tpu.memory_space<vmem>>, vector<1x8x8x32xf32>
    %11 = vector.shape_cast %10 : vector<1x8x8x32xf32> to vector<8x8x32xf32>
    %12 = vector.shape_cast %9 : vector<8x8x32xf32> to vector<1x8x8x32xf32>
    tpu.vector_store %arg5[%c0_8, %c0_9, %c0_10, %c0_11], %12 {strides = array<i32>} : memref<4x8x8x32xf32, #tpu.memory_space<vmem>>, vector<1x8x8x32xf32>,
    %c1 = arith.constant 1 : index
    %c0_12 = arith.constant 0 : index
    %c0_13 = arith.constant 0 : index
    %13 = vector.load %arg1[%c1, %c0_12, %c0_13] : memref<4x32x32xf32, #tpu.memory_space<vmem>>, vector<1x32x32xf32>
    %14 = vector.shape_cast %13 : vector<1x32x32xf32> to vector<32x32xf32>
    %cst_14 = arith.constant dense<0.000000e+00> : vector<64x32xf32>
    %15 = tpu.matmul %1, %14, %cst_14 {dimension_numbers = #tpu.dot_dimension_numbers<[1], [0], [0], [1], [0, 0, 1, 1], [], []>} : vector<64x32xf32>, vector<32x32xf32>, vector<64x32xf32> -> vector<64x32xf32>
    %c1_15 = arith.constant 1 : index
    %c0_16 = arith.constant 0 : index
    %c0_17 = arith.constant 0 : index
    %16 = vector.load %arg3[%c1_15, %c0_16, %c0_17] : memref<4x1x32xf32, #tpu.memory_space<vmem>>, vector<1x1x32xf32>
    %17 = vector.shape_cast %16 : vector<1x1x32xf32> to vector<1x32xf32>
    %18 = vector.broadcast %17 : vector<1x32xf32> to vector<64x32xf32>
    %19 = arith.addf %15, %18 : vector<64x32xf32>
    %20 = vector.shape_cast %19 : vector<64x32xf32> to vector<8x8x32xf32>
    %c1_18 = arith.constant 1 : index
    %c0_19 = arith.constant 0 : index
    %c0_20 = arith.constant 0 : index
    %c0_21 = arith.constant 0 : index
    %21 = vector.load %arg5[%c1_18, %c0_19, %c0_20, %c0_21] : memref<4x8x8x32xf32, #tpu.memory_space<vmem>>, vector<1x8x8x32xf32>
    %22 = vector.shape_cast %21 : vector<1x8x8x32xf32> to vector<8x8x32xf32>
    %23 = vector.shape_cast %20 : vector<8x8x32xf32> to vector<1x8x8x32xf32>
    tpu.vector_store %arg5[%c1_18, %c0_19, %c0_20, %c0_21], %23 {strides = array<i32>} : memref<4x8x8x32xf32, #tpu.memory_space<vmem>>, vector<1x8x8x32xf32>,
    %c2 = arith.constant 2 : index
    %c0_22 = arith.constant 0 : index
    %c0_23 = arith.constant 0 : index
    %24 = vector.load %arg1[%c2, %c0_22, %c0_23] : memref<4x32x32xf32, #tpu.memory_space<vmem>>, vector<1x32x32xf32>
    %25 = vector.shape_cast %24 : vector<1x32x32xf32> to vector<32x32xf32>
    %cst_24 = arith.constant dense<0.000000e+00> : vector<64x32xf32>
    %26 = tpu.matmul %1, %25, %cst_24 {dimension_numbers = #tpu.dot_dimension_numbers<[1], [0], [0], [1], [0, 0, 1, 1], [], []>} : vector<64x32xf32>, vector<32x32xf32>, vector<64x32xf32> -> vector<64x32xf32>
    %c2_25 = arith.constant 2 : index
    %c0_26 = arith.constant 0 : index
    %c0_27 = arith.constant 0 : index
    %27 = vector.load %arg3[%c2_25, %c0_26, %c0_27] : memref<4x1x32xf32, #tpu.memory_space<vmem>>, vector<1x1x32xf32>
    %28 = vector.shape_cast %27 : vector<1x1x32xf32> to vector<1x32xf32>
    %29 = vector.broadcast %28 : vector<1x32xf32> to vector<64x32xf32>
    %30 = arith.addf %26, %29 : vector<64x32xf32>
    %31 = vector.shape_cast %30 : vector<64x32xf32> to vector<8x8x32xf32>
    %c2_28 = arith.constant 2 : index
    %c0_29 = arith.constant 0 : index
    %c0_30 = arith.constant 0 : index
    %c0_31 = arith.constant 0 : index
    %32 = vector.load %arg5[%c2_28, %c0_29, %c0_30, %c0_31] : memref<4x8x8x32xf32, #tpu.memory_space<vmem>>, vector<1x8x8x32xf32>
    %33 = vector.shape_cast %32 : vector<1x8x8x32xf32> to vector<8x8x32xf32>
    %34 = vector.shape_cast %31 : vector<8x8x32xf32> to vector<1x8x8x32xf32>
    tpu.vector_store %arg5[%c2_28, %c0_29, %c0_30, %c0_31], %34 {strides = array<i32>} : memref<4x8x8x32xf32, #tpu.memory_space<vmem>>, vector<1x8x8x32xf32>,
    %c3 = arith.constant 3 : index
    %c0_32 = arith.constant 0 : index
    %c0_33 = arith.constant 0 : index
    %35 = vector.load %arg1[%c3, %c0_32, %c0_33] : memref<4x32x32xf32, #tpu.memory_space<vmem>>, vector<1x32x32xf32>
    %36 = vector.shape_cast %35 : vector<1x32x32xf32> to vector<32x32xf32>
    %cst_34 = arith.constant dense<0.000000e+00> : vector<64x32xf32>
    %37 = tpu.matmul %1, %36, %cst_34 {dimension_numbers = #tpu.dot_dimension_numbers<[1], [0], [0], [1], [0, 0, 1, 1], [], []>} : vector<64x32xf32>, vector<32x32xf32>, vector<64x32xf32> -> vector<64x32xf32>
    %c3_35 = arith.constant 3 : index
    %c0_36 = arith.constant 0 : index
    %c0_37 = arith.constant 0 : index
    %38 = vector.load %arg3[%c3_35, %c0_36, %c0_37] : memref<4x1x32xf32, #tpu.memory_space<vmem>>, vector<1x1x32xf32>
    %39 = vector.shape_cast %38 : vector<1x1x32xf32> to vector<1x32xf32>
    %40 = vector.broadcast %39 : vector<1x32xf32> to vector<64x32xf32>
    %41 = arith.addf %37, %40 : vector<64x32xf32>
    %42 = vector.shape_cast %41 : vector<64x32xf32> to vector<8x8x32xf32>
    %c3_38 = arith.constant 3 : index
    %c0_39 = arith.constant 0 : index
    %c0_40 = arith.constant 0 : index
    %c0_41 = arith.constant 0 : index
    %43 = vector.load %arg5[%c3_38, %c0_39, %c0_40, %c0_41] : memref<4x8x8x32xf32, #tpu.memory_space<vmem>>, vector<1x8x8x32xf32>
    %44 = vector.shape_cast %43 : vector<1x8x8x32xf32> to vector<8x8x32xf32>
    %45 = vector.shape_cast %42 : vector<8x8x32xf32> to vector<1x8x8x32xf32>
    tpu.vector_store %arg5[%c3_38, %c0_39, %c0_40, %c0_41], %45 {strides = array<i32>} : memref<4x8x8x32xf32, #tpu.memory_space<vmem>>, vector<1x8x8x32xf32>,
    %cst_42 = arith.constant 0.000000e+00 : f32
    %46 = vector.broadcast %cst_42 : f32 to vector<8x32xf32>
    %cst_43 = arith.constant 0.000000e+00 : f32
    %47 = vector.broadcast %cst_43 : f32 to vector<8x32xf32>
    %c0_i32 = arith.constant 0 : i32
    %c0_44 = arith.constant 0 : index
    %c0_45 = arith.constant 0 : index
    %c0_46 = arith.constant 0 : index
    %48 = vector.load %arg2[%c0_44, %c0_45, %c0_46] : memref<4x32x32xf32, #tpu.memory_space<vmem>>, vector<1x32x32xf32>
    %49 = vector.shape_cast %48 : vector<1x32x32xf32> to vector<32x32xf32>
    %cst_47 = arith.constant dense<0.000000e+00> : vector<8x32xf32>
    %50 = tpu.matmul %46, %49, %cst_47 {dimension_numbers = #tpu.dot_dimension_numbers<[1], [0], [0], [1], [0, 0, 1, 1], [], []>} : vector<8x32xf32>, vector<32x32xf32>, vector<8x32xf32> -> vector<8x32xf32>
    %c1_48 = arith.constant 1 : index
    %c0_49 = arith.constant 0 : index
    %c0_50 = arith.constant 0 : index
    %51 = vector.load %arg2[%c1_48, %c0_49, %c0_50] : memref<4x32x32xf32, #tpu.memory_space<vmem>>, vector<1x32x32xf32>
    %52 = vector.shape_cast %51 : vector<1x32x32xf32> to vector<32x32xf32>
    %cst_51 = arith.constant dense<0.000000e+00> : vector<8x32xf32>
    %53 = tpu.matmul %46, %52, %cst_51 {dimension_numbers = #tpu.dot_dimension_numbers<[1], [0], [0], [1], [0, 0, 1, 1], [], []>} : vector<8x32xf32>, vector<32x32xf32>, vector<8x32xf32> -> vector<8x32xf32>
    %c2_52 = arith.constant 2 : index
    %c0_53 = arith.constant 0 : index
    %c0_54 = arith.constant 0 : index
    %54 = vector.load %arg2[%c2_52, %c0_53, %c0_54] : memref<4x32x32xf32, #tpu.memory_space<vmem>>, vector<1x32x32xf32>
    %55 = vector.shape_cast %54 : vector<1x32x32xf32> to vector<32x32xf32>
    %cst_55 = arith.constant dense<0.000000e+00> : vector<8x32xf32>
    %56 = tpu.matmul %46, %55, %cst_55 {dimension_numbers = #tpu.dot_dimension_numbers<[1], [0], [0], [1], [0, 0, 1, 1], [], []>} : vector<8x32xf32>, vector<32x32xf32>, vector<8x32xf32> -> vector<8x32xf32>
    %c3_56 = arith.constant 3 : index
    %c0_57 = arith.constant 0 : index
    %c0_58 = arith.constant 0 : index
    %57 = vector.load %arg2[%c3_56, %c0_57, %c0_58] : memref<4x32x32xf32, #tpu.memory_space<vmem>>, vector<1x32x32xf32>
    %58 = vector.shape_cast %57 : vector<1x32x32xf32> to vector<32x32xf32>
    %cst_59 = arith.constant dense<0.000000e+00> : vector<8x32xf32>
    %59 = tpu.matmul %46, %58, %cst_59 {dimension_numbers = #tpu.dot_dimension_numbers<[1], [0], [0], [1], [0, 0, 1, 1], [], []>} : vector<8x32xf32>, vector<32x32xf32>, vector<8x32xf32> -> vector<8x32xf32>
    %c0_60 = arith.constant 0 : index
    %60 = arith.index_cast %c0_i32 : i32 to index
    %c0_61 = arith.constant 0 : index
    %c0_62 = arith.constant 0 : index
    %61 = vector.load %arg5[%c0_60, %60, %c0_61, %c0_62] : memref<4x8x8x32xf32, #tpu.memory_space<vmem>>, vector<1x1x8x32xf32>
    %62 = vector.shape_cast %61 : vector<1x1x8x32xf32> to vector<8x32xf32>
    %63 = arith.addf %62, %50 : vector<8x32xf32>
    %64 = arith.negf %63 : vector<8x32xf32>
    %65 = math.exp %64 : vector<8x32xf32>
    %cst_63 = arith.constant 1.000000e+00 : f32
    %66 = vector.broadcast %cst_63 : f32 to vector<8x32xf32>
    %67 = arith.addf %66, %65 : vector<8x32xf32>
    %68 = arith.divf %66, %67 : vector<8x32xf32>
    %c1_64 = arith.constant 1 : index
    %69 = arith.index_cast %c0_i32 : i32 to index
    %c0_65 = arith.constant 0 : index
    %c0_66 = arith.constant 0 : index
    %70 = vector.load %arg5[%c1_64, %69, %c0_65, %c0_66] : memref<4x8x8x32xf32, #tpu.memory_space<vmem>>, vector<1x1x8x32xf32>
    %71 = vector.shape_cast %70 : vector<1x1x8x32xf32> to vector<8x32xf32>
    %72 = arith.addf %71, %53 : vector<8x32xf32>
    %73 = arith.negf %72 : vector<8x32xf32>
    %74 = math.exp %73 : vector<8x32xf32>
    %cst_67 = arith.constant 1.000000e+00 : f32
    %75 = vector.broadcast %cst_67 : f32 to vector<8x32xf32>
    %76 = arith.addf %75, %74 : vector<8x32xf32>
    %77 = arith.divf %75, %76 : vector<8x32xf32>
    %c2_68 = arith.constant 2 : index
    %78 = arith.index_cast %c0_i32 : i32 to index
    %c0_69 = arith.constant 0 : index
    %c0_70 = arith.constant 0 : index
    %79 = vector.load %arg5[%c2_68, %78, %c0_69, %c0_70] : memref<4x8x8x32xf32, #tpu.memory_space<vmem>>, vector<1x1x8x32xf32>
    %80 = vector.shape_cast %79 : vector<1x1x8x32xf32> to vector<8x32xf32>
    %81 = arith.addf %80, %56 : vector<8x32xf32>
    %82 = math.tanh %81 : vector<8x32xf32>
    %c3_71 = arith.constant 3 : index
    %83 = arith.index_cast %c0_i32 : i32 to index
    %c0_72 = arith.constant 0 : index
    %c0_73 = arith.constant 0 : index
    %84 = vector.load %arg5[%c3_71, %83, %c0_72, %c0_73] : memref<4x8x8x32xf32, #tpu.memory_space<vmem>>, vector<1x1x8x32xf32>
    %85 = vector.shape_cast %84 : vector<1x1x8x32xf32> to vector<8x32xf32>
    %86 = arith.addf %85, %59 : vector<8x32xf32>
    %87 = arith.negf %86 : vector<8x32xf32>
    %88 = math.exp %87 : vector<8x32xf32>
    %cst_74 = arith.constant 1.000000e+00 : f32
    %89 = vector.broadcast %cst_74 : f32 to vector<8x32xf32>
    %90 = arith.addf %89, %88 : vector<8x32xf32>
    %91 = arith.divf %89, %90 : vector<8x32xf32>
    %92 = arith.mulf %77, %47 : vector<8x32xf32>
    %93 = arith.mulf %68, %82 : vector<8x32xf32>
    %94 = arith.addf %92, %93 : vector<8x32xf32>
    %95 = math.tanh %94 : vector<8x32xf32>
    %96 = arith.mulf %91, %95 : vector<8x32xf32>
    %c1_i32 = arith.constant 1 : i32
    %c0_75 = arith.constant 0 : index
    %c0_76 = arith.constant 0 : index
    %c0_77 = arith.constant 0 : index
    %97 = vector.load %arg2[%c0_75, %c0_76, %c0_77] : memref<4x32x32xf32, #tpu.memory_space<vmem>>, vector<1x32x32xf32>
    %98 = vector.shape_cast %97 : vector<1x32x32xf32> to vector<32x32xf32>
    %cst_78 = arith.constant dense<0.000000e+00> : vector<8x32xf32>
    %99 = tpu.matmul %96, %98, %cst_78 {dimension_numbers = #tpu.dot_dimension_numbers<[1], [0], [0], [1], [0, 0, 1, 1], [], []>} : vector<8x32xf32>, vector<32x32xf32>, vector<8x32xf32> -> vector<8x32xf32>
    %c1_79 = arith.constant 1 : index
    %c0_80 = arith.constant 0 : index
    %c0_81 = arith.constant 0 : index
    %100 = vector.load %arg2[%c1_79, %c0_80, %c0_81] : memref<4x32x32xf32, #tpu.memory_space<vmem>>, vector<1x32x32xf32>
    %101 = vector.shape_cast %100 : vector<1x32x32xf32> to vector<32x32xf32>
    %cst_82 = arith.constant dense<0.000000e+00> : vector<8x32xf32>
    %102 = tpu.matmul %96, %101, %cst_82 {dimension_numbers = #tpu.dot_dimension_numbers<[1], [0], [0], [1], [0, 0, 1, 1], [], []>} : vector<8x32xf32>, vector<32x32xf32>, vector<8x32xf32> -> vector<8x32xf32>
    %c2_83 = arith.constant 2 : index
    %c0_84 = arith.constant 0 : index
    %c0_85 = arith.constant 0 : index
    %103 = vector.load %arg2[%c2_83, %c0_84, %c0_85] : memref<4x32x32xf32, #tpu.memory_space<vmem>>, vector<1x32x32xf32>
    %104 = vector.shape_cast %103 : vector<1x32x32xf32> to vector<32x32xf32>
    %cst_86 = arith.constant dense<0.000000e+00> : vector<8x32xf32>
    %105 = tpu.matmul %96, %104, %cst_86 {dimension_numbers = #tpu.dot_dimension_numbers<[1], [0], [0], [1], [0, 0, 1, 1], [], []>} : vector<8x32xf32>, vector<32x32xf32>, vector<8x32xf32> -> vector<8x32xf32>
    %c3_87 = arith.constant 3 : index
    %c0_88 = arith.constant 0 : index
    %c0_89 = arith.constant 0 : index
    %106 = vector.load %arg2[%c3_87, %c0_88, %c0_89] : memref<4x32x32xf32, #tpu.memory_space<vmem>>, vector<1x32x32xf32>
    %107 = vector.shape_cast %106 : vector<1x32x32xf32> to vector<32x32xf32>
    %cst_90 = arith.constant dense<0.000000e+00> : vector<8x32xf32>
    %108 = tpu.matmul %96, %107, %cst_90 {dimension_numbers = #tpu.dot_dimension_numbers<[1], [0], [0], [1], [0, 0, 1, 1], [], []>} : vector<8x32xf32>, vector<32x32xf32>, vector<8x32xf32> -> vector<8x32xf32>
    %c0_91 = arith.constant 0 : index
    %109 = arith.index_cast %c1_i32 : i32 to index
    %c0_92 = arith.constant 0 : index
    %c0_93 = arith.constant 0 : index
    %110 = vector.load %arg5[%c0_91, %109, %c0_92, %c0_93] : memref<4x8x8x32xf32, #tpu.memory_space<vmem>>, vector<1x1x8x32xf32>
    %111 = vector.shape_cast %110 : vector<1x1x8x32xf32> to vector<8x32xf32>
    %112 = arith.addf %111, %99 : vector<8x32xf32>
    %113 = arith.negf %112 : vector<8x32xf32>
    %114 = math.exp %113 : vector<8x32xf32>
    %cst_94 = arith.constant 1.000000e+00 : f32
    %115 = vector.broadcast %cst_94 : f32 to vector<8x32xf32>
    %116 = arith.addf %115, %114 : vector<8x32xf32>
    %117 = arith.divf %115, %116 : vector<8x32xf32>
    %c1_95 = arith.constant 1 : index
    %118 = arith.index_cast %c1_i32 : i32 to index
    %c0_96 = arith.constant 0 : index
    %c0_97 = arith.constant 0 : index
    %119 = vector.load %arg5[%c1_95, %118, %c0_96, %c0_97] : memref<4x8x8x32xf32, #tpu.memory_space<vmem>>, vector<1x1x8x32xf32>
    %120 = vector.shape_cast %119 : vector<1x1x8x32xf32> to vector<8x32xf32>
    %121 = arith.addf %120, %102 : vector<8x32xf32>
    %122 = arith.negf %121 : vector<8x32xf32>
    %123 = math.exp %122 : vector<8x32xf32>
    %cst_98 = arith.constant 1.000000e+00 : f32
    %124 = vector.broadcast %cst_98 : f32 to vector<8x32xf32>
    %125 = arith.addf %124, %123 : vector<8x32xf32>
    %126 = arith.divf %124, %125 : vector<8x32xf32>
    %c2_99 = arith.constant 2 : index
    %127 = arith.index_cast %c1_i32 : i32 to index
    %c0_100 = arith.constant 0 : index
    %c0_101 = arith.constant 0 : index
    %128 = vector.load %arg5[%c2_99, %127, %c0_100, %c0_101] : memref<4x8x8x32xf32, #tpu.memory_space<vmem>>, vector<1x1x8x32xf32>
    %129 = vector.shape_cast %128 : vector<1x1x8x32xf32> to vector<8x32xf32>
    %130 = arith.addf %129, %105 : vector<8x32xf32>
    %131 = math.tanh %130 : vector<8x32xf32>
    %c3_102 = arith.constant 3 : index
    %132 = arith.index_cast %c1_i32 : i32 to index
    %c0_103 = arith.constant 0 : index
    %c0_104 = arith.constant 0 : index
    %133 = vector.load %arg5[%c3_102, %132, %c0_103, %c0_104] : memref<4x8x8x32xf32, #tpu.memory_space<vmem>>, vector<1x1x8x32xf32>
    %134 = vector.shape_cast %133 : vector<1x1x8x32xf32> to vector<8x32xf32>
    %135 = arith.addf %134, %108 : vector<8x32xf32>
    %136 = arith.negf %135 : vector<8x32xf32>
    %137 = math.exp %136 : vector<8x32xf32>
    %cst_105 = arith.constant 1.000000e+00 : f32
    %138 = vector.broadcast %cst_105 : f32 to vector<8x32xf32>
    %139 = arith.addf %138, %137 : vector<8x32xf32>
    %140 = arith.divf %138, %139 : vector<8x32xf32>
    %141 = arith.mulf %126, %94 : vector<8x32xf32>
    %142 = arith.mulf %117, %131 : vector<8x32xf32>
    %143 = arith.addf %141, %142 : vector<8x32xf32>
    %144 = math.tanh %143 : vector<8x32xf32>
    %145 = arith.mulf %140, %144 : vector<8x32xf32>
    %c2_i32 = arith.constant 2 : i32
    %c0_106 = arith.constant 0 : index
    %c0_107 = arith.constant 0 : index
    %c0_108 = arith.constant 0 : index
    %146 = vector.load %arg2[%c0_106, %c0_107, %c0_108] : memref<4x32x32xf32, #tpu.memory_space<vmem>>, vector<1x32x32xf32>
    %147 = vector.shape_cast %146 : vector<1x32x32xf32> to vector<32x32xf32>
    %cst_109 = arith.constant dense<0.000000e+00> : vector<8x32xf32>
    %148 = tpu.matmul %145, %147, %cst_109 {dimension_numbers = #tpu.dot_dimension_numbers<[1], [0], [0], [1], [0, 0, 1, 1], [], []>} : vector<8x32xf32>, vector<32x32xf32>, vector<8x32xf32> -> vector<8x32xf32>
    %c1_110 = arith.constant 1 : index
    %c0_111 = arith.constant 0 : index
    %c0_112 = arith.constant 0 : index
    %149 = vector.load %arg2[%c1_110, %c0_111, %c0_112] : memref<4x32x32xf32, #tpu.memory_space<vmem>>, vector<1x32x32xf32>
    %150 = vector.shape_cast %149 : vector<1x32x32xf32> to vector<32x32xf32>
    %cst_113 = arith.constant dense<0.000000e+00> : vector<8x32xf32>
    %151 = tpu.matmul %145, %150, %cst_113 {dimension_numbers = #tpu.dot_dimension_numbers<[1], [0], [0], [1], [0, 0, 1, 1], [], []>} : vector<8x32xf32>, vector<32x32xf32>, vector<8x32xf32> -> vector<8x32xf32>
    %c2_114 = arith.constant 2 : index
    %c0_115 = arith.constant 0 : index
    %c0_116 = arith.constant 0 : index
    %152 = vector.load %arg2[%c2_114, %c0_115, %c0_116] : memref<4x32x32xf32, #tpu.memory_space<vmem>>, vector<1x32x32xf32>
    %153 = vector.shape_cast %152 : vector<1x32x32xf32> to vector<32x32xf32>
    %cst_117 = arith.constant dense<0.000000e+00> : vector<8x32xf32>
    %154 = tpu.matmul %145, %153, %cst_117 {dimension_numbers = #tpu.dot_dimension_numbers<[1], [0], [0], [1], [0, 0, 1, 1], [], []>} : vector<8x32xf32>, vector<32x32xf32>, vector<8x32xf32> -> vector<8x32xf32>
    %c3_118 = arith.constant 3 : index
    %c0_119 = arith.constant 0 : index
    %c0_120 = arith.constant 0 : index
    %155 = vector.load %arg2[%c3_118, %c0_119, %c0_120] : memref<4x32x32xf32, #tpu.memory_space<vmem>>, vector<1x32x32xf32>
    %156 = vector.shape_cast %155 : vector<1x32x32xf32> to vector<32x32xf32>
    %cst_121 = arith.constant dense<0.000000e+00> : vector<8x32xf32>
    %157 = tpu.matmul %145, %156, %cst_121 {dimension_numbers = #tpu.dot_dimension_numbers<[1], [0], [0], [1], [0, 0, 1, 1], [], []>} : vector<8x32xf32>, vector<32x32xf32>, vector<8x32xf32> -> vector<8x32xf32>
    %c0_122 = arith.constant 0 : index
    %158 = arith.index_cast %c2_i32 : i32 to index
    %c0_123 = arith.constant 0 : index
    %c0_124 = arith.constant 0 : index
    %159 = vector.load %arg5[%c0_122, %158, %c0_123, %c0_124] : memref<4x8x8x32xf32, #tpu.memory_space<vmem>>, vector<1x1x8x32xf32>
    %160 = vector.shape_cast %159 : vector<1x1x8x32xf32> to vector<8x32xf32>
    %161 = arith.addf %160, %148 : vector<8x32xf32>
    %162 = arith.negf %161 : vector<8x32xf32>
    %163 = math.exp %162 : vector<8x32xf32>
    %cst_125 = arith.constant 1.000000e+00 : f32
    %164 = vector.broadcast %cst_125 : f32 to vector<8x32xf32>
    %165 = arith.addf %164, %163 : vector<8x32xf32>
    %166 = arith.divf %164, %165 : vector<8x32xf32>
    %c1_126 = arith.constant 1 : index
    %167 = arith.index_cast %c2_i32 : i32 to index
    %c0_127 = arith.constant 0 : index
    %c0_128 = arith.constant 0 : index
    %168 = vector.load %arg5[%c1_126, %167, %c0_127, %c0_128] : memref<4x8x8x32xf32, #tpu.memory_space<vmem>>, vector<1x1x8x32xf32>
    %169 = vector.shape_cast %168 : vector<1x1x8x32xf32> to vector<8x32xf32>
    %170 = arith.addf %169, %151 : vector<8x32xf32>
    %171 = arith.negf %170 : vector<8x32xf32>
    %172 = math.exp %171 : vector<8x32xf32>
    %cst_129 = arith.constant 1.000000e+00 : f32
    %173 = vector.broadcast %cst_129 : f32 to vector<8x32xf32>
    %174 = arith.addf %173, %172 : vector<8x32xf32>
    %175 = arith.divf %173, %174 : vector<8x32xf32>
    %c2_130 = arith.constant 2 : index
    %176 = arith.index_cast %c2_i32 : i32 to index
    %c0_131 = arith.constant 0 : index
    %c0_132 = arith.constant 0 : index
    %177 = vector.load %arg5[%c2_130, %176, %c0_131, %c0_132] : memref<4x8x8x32xf32, #tpu.memory_space<vmem>>, vector<1x1x8x32xf32>
    %178 = vector.shape_cast %177 : vector<1x1x8x32xf32> to vector<8x32xf32>
    %179 = arith.addf %178, %154 : vector<8x32xf32>
    %180 = math.tanh %179 : vector<8x32xf32>
    %c3_133 = arith.constant 3 : index
    %181 = arith.index_cast %c2_i32 : i32 to index
    %c0_134 = arith.constant 0 : index
    %c0_135 = arith.constant 0 : index
    %182 = vector.load %arg5[%c3_133, %181, %c0_134, %c0_135] : memref<4x8x8x32xf32, #tpu.memory_space<vmem>>, vector<1x1x8x32xf32>
    %183 = vector.shape_cast %182 : vector<1x1x8x32xf32> to vector<8x32xf32>
    %184 = arith.addf %183, %157 : vector<8x32xf32>
    %185 = arith.negf %184 : vector<8x32xf32>
    %186 = math.exp %185 : vector<8x32xf32>
    %cst_136 = arith.constant 1.000000e+00 : f32
    %187 = vector.broadcast %cst_136 : f32 to vector<8x32xf32>
    %188 = arith.addf %187, %186 : vector<8x32xf32>
    %189 = arith.divf %187, %188 : vector<8x32xf32>
    %190 = arith.mulf %175, %143 : vector<8x32xf32>
    %191 = arith.mulf %166, %180 : vector<8x32xf32>
    %192 = arith.addf %190, %191 : vector<8x32xf32>
    %193 = math.tanh %192 : vector<8x32xf32>
    %194 = arith.mulf %189, %193 : vector<8x32xf32>
    %c3_i32 = arith.constant 3 : i32
    %c0_137 = arith.constant 0 : index
    %c0_138 = arith.constant 0 : index
    %c0_139 = arith.constant 0 : index
    %195 = vector.load %arg2[%c0_137, %c0_138, %c0_139] : memref<4x32x32xf32, #tpu.memory_space<vmem>>, vector<1x32x32xf32>
    %196 = vector.shape_cast %195 : vector<1x32x32xf32> to vector<32x32xf32>
    %cst_140 = arith.constant dense<0.000000e+00> : vector<8x32xf32>
    %197 = tpu.matmul %194, %196, %cst_140 {dimension_numbers = #tpu.dot_dimension_numbers<[1], [0], [0], [1], [0, 0, 1, 1], [], []>} : vector<8x32xf32>, vector<32x32xf32>, vector<8x32xf32> -> vector<8x32xf32>
    %c1_141 = arith.constant 1 : index
    %c0_142 = arith.constant 0 : index
    %c0_143 = arith.constant 0 : index
    %198 = vector.load %arg2[%c1_141, %c0_142, %c0_143] : memref<4x32x32xf32, #tpu.memory_space<vmem>>, vector<1x32x32xf32>
    %199 = vector.shape_cast %198 : vector<1x32x32xf32> to vector<32x32xf32>
    %cst_144 = arith.constant dense<0.000000e+00> : vector<8x32xf32>
    %200 = tpu.matmul %194, %199, %cst_144 {dimension_numbers = #tpu.dot_dimension_numbers<[1], [0], [0], [1], [0, 0, 1, 1], [], []>} : vector<8x32xf32>, vector<32x32xf32>, vector<8x32xf32> -> vector<8x32xf32>
    %c2_145 = arith.constant 2 : index
    %c0_146 = arith.constant 0 : index
    %c0_147 = arith.constant 0 : index
    %201 = vector.load %arg2[%c2_145, %c0_146, %c0_147] : memref<4x32x32xf32, #tpu.memory_space<vmem>>, vector<1x32x32xf32>
    %202 = vector.shape_cast %201 : vector<1x32x32xf32> to vector<32x32xf32>
    %cst_148 = arith.constant dense<0.000000e+00> : vector<8x32xf32>
    %203 = tpu.matmul %194, %202, %cst_148 {dimension_numbers = #tpu.dot_dimension_numbers<[1], [0], [0], [1], [0, 0, 1, 1], [], []>} : vector<8x32xf32>, vector<32x32xf32>, vector<8x32xf32> -> vector<8x32xf32>
    %c3_149 = arith.constant 3 : index
    %c0_150 = arith.constant 0 : index
    %c0_151 = arith.constant 0 : index
    %204 = vector.load %arg2[%c3_149, %c0_150, %c0_151] : memref<4x32x32xf32, #tpu.memory_space<vmem>>, vector<1x32x32xf32>
    %205 = vector.shape_cast %204 : vector<1x32x32xf32> to vector<32x32xf32>
    %cst_152 = arith.constant dense<0.000000e+00> : vector<8x32xf32>
    %206 = tpu.matmul %194, %205, %cst_152 {dimension_numbers = #tpu.dot_dimension_numbers<[1], [0], [0], [1], [0, 0, 1, 1], [], []>} : vector<8x32xf32>, vector<32x32xf32>, vector<8x32xf32> -> vector<8x32xf32>
    %c0_153 = arith.constant 0 : index
    %207 = arith.index_cast %c3_i32 : i32 to index
    %c0_154 = arith.constant 0 : index
    %c0_155 = arith.constant 0 : index
    %208 = vector.load %arg5[%c0_153, %207, %c0_154, %c0_155] : memref<4x8x8x32xf32, #tpu.memory_space<vmem>>, vector<1x1x8x32xf32>
    %209 = vector.shape_cast %208 : vector<1x1x8x32xf32> to vector<8x32xf32>
    %210 = arith.addf %209, %197 : vector<8x32xf32>
    %211 = arith.negf %210 : vector<8x32xf32>
    %212 = math.exp %211 : vector<8x32xf32>
    %cst_156 = arith.constant 1.000000e+00 : f32
    %213 = vector.broadcast %cst_156 : f32 to vector<8x32xf32>
    %214 = arith.addf %213, %212 : vector<8x32xf32>
    %215 = arith.divf %213, %214 : vector<8x32xf32>
    %c1_157 = arith.constant 1 : index
    %216 = arith.index_cast %c3_i32 : i32 to index
    %c0_158 = arith.constant 0 : index
    %c0_159 = arith.constant 0 : index
    %217 = vector.load %arg5[%c1_157, %216, %c0_158, %c0_159] : memref<4x8x8x32xf32, #tpu.memory_space<vmem>>, vector<1x1x8x32xf32>
    %218 = vector.shape_cast %217 : vector<1x1x8x32xf32> to vector<8x32xf32>
    %219 = arith.addf %218, %200 : vector<8x32xf32>
    %220 = arith.negf %219 : vector<8x32xf32>
    %221 = math.exp %220 : vector<8x32xf32>
    %cst_160 = arith.constant 1.000000e+00 : f32
    %222 = vector.broadcast %cst_160 : f32 to vector<8x32xf32>
    %223 = arith.addf %222, %221 : vector<8x32xf32>
    %224 = arith.divf %222, %223 : vector<8x32xf32>
    %c2_161 = arith.constant 2 : index
    %225 = arith.index_cast %c3_i32 : i32 to index
    %c0_162 = arith.constant 0 : index
    %c0_163 = arith.constant 0 : index
    %226 = vector.load %arg5[%c2_161, %225, %c0_162, %c0_163] : memref<4x8x8x32xf32, #tpu.memory_space<vmem>>, vector<1x1x8x32xf32>
    %227 = vector.shape_cast %226 : vector<1x1x8x32xf32> to vector<8x32xf32>
    %228 = arith.addf %227, %203 : vector<8x32xf32>
    %229 = math.tanh %228 : vector<8x32xf32>
    %c3_164 = arith.constant 3 : index
    %230 = arith.index_cast %c3_i32 : i32 to index
    %c0_165 = arith.constant 0 : index
    %c0_166 = arith.constant 0 : index
    %231 = vector.load %arg5[%c3_164, %230, %c0_165, %c0_166] : memref<4x8x8x32xf32, #tpu.memory_space<vmem>>, vector<1x1x8x32xf32>
    %232 = vector.shape_cast %231 : vector<1x1x8x32xf32> to vector<8x32xf32>
    %233 = arith.addf %232, %206 : vector<8x32xf32>
    %234 = arith.negf %233 : vector<8x32xf32>
    %235 = math.exp %234 : vector<8x32xf32>
    %cst_167 = arith.constant 1.000000e+00 : f32
    %236 = vector.broadcast %cst_167 : f32 to vector<8x32xf32>
    %237 = arith.addf %236, %235 : vector<8x32xf32>
    %238 = arith.divf %236, %237 : vector<8x32xf32>
    %239 = arith.mulf %224, %192 : vector<8x32xf32>
    %240 = arith.mulf %215, %229 : vector<8x32xf32>
    %241 = arith.addf %239, %240 : vector<8x32xf32>
    %242 = math.tanh %241 : vector<8x32xf32>
    %243 = arith.mulf %238, %242 : vector<8x32xf32>
    %c4_i32 = arith.constant 4 : i32
    %c0_168 = arith.constant 0 : index
    %c0_169 = arith.constant 0 : index
    %c0_170 = arith.constant 0 : index
    %244 = vector.load %arg2[%c0_168, %c0_169, %c0_170] : memref<4x32x32xf32, #tpu.memory_space<vmem>>, vector<1x32x32xf32>
    %245 = vector.shape_cast %244 : vector<1x32x32xf32> to vector<32x32xf32>
    %cst_171 = arith.constant dense<0.000000e+00> : vector<8x32xf32>
    %246 = tpu.matmul %243, %245, %cst_171 {dimension_numbers = #tpu.dot_dimension_numbers<[1], [0], [0], [1], [0, 0, 1, 1], [], []>} : vector<8x32xf32>, vector<32x32xf32>, vector<8x32xf32> -> vector<8x32xf32>
    %c1_172 = arith.constant 1 : index
    %c0_173 = arith.constant 0 : index
    %c0_174 = arith.constant 0 : index
    %247 = vector.load %arg2[%c1_172, %c0_173, %c0_174] : memref<4x32x32xf32, #tpu.memory_space<vmem>>, vector<1x32x32xf32>
    %248 = vector.shape_cast %247 : vector<1x32x32xf32> to vector<32x32xf32>
    %cst_175 = arith.constant dense<0.000000e+00> : vector<8x32xf32>
    %249 = tpu.matmul %243, %248, %cst_175 {dimension_numbers = #tpu.dot_dimension_numbers<[1], [0], [0], [1], [0, 0, 1, 1], [], []>} : vector<8x32xf32>, vector<32x32xf32>, vector<8x32xf32> -> vector<8x32xf32>
    %c2_176 = arith.constant 2 : index
    %c0_177 = arith.constant 0 : index
    %c0_178 = arith.constant 0 : index
    %250 = vector.load %arg2[%c2_176, %c0_177, %c0_178] : memref<4x32x32xf32, #tpu.memory_space<vmem>>, vector<1x32x32xf32>
    %251 = vector.shape_cast %250 : vector<1x32x32xf32> to vector<32x32xf32>
    %cst_179 = arith.constant dense<0.000000e+00> : vector<8x32xf32>
    %252 = tpu.matmul %243, %251, %cst_179 {dimension_numbers = #tpu.dot_dimension_numbers<[1], [0], [0], [1], [0, 0, 1, 1], [], []>} : vector<8x32xf32>, vector<32x32xf32>, vector<8x32xf32> -> vector<8x32xf32>
    %c3_180 = arith.constant 3 : index
    %c0_181 = arith.constant 0 : index
    %c0_182 = arith.constant 0 : index
    %253 = vector.load %arg2[%c3_180, %c0_181, %c0_182] : memref<4x32x32xf32, #tpu.memory_space<vmem>>, vector<1x32x32xf32>
    %254 = vector.shape_cast %253 : vector<1x32x32xf32> to vector<32x32xf32>
    %cst_183 = arith.constant dense<0.000000e+00> : vector<8x32xf32>
    %255 = tpu.matmul %243, %254, %cst_183 {dimension_numbers = #tpu.dot_dimension_numbers<[1], [0], [0], [1], [0, 0, 1, 1], [], []>} : vector<8x32xf32>, vector<32x32xf32>, vector<8x32xf32> -> vector<8x32xf32>
    %c0_184 = arith.constant 0 : index
    %256 = arith.index_cast %c4_i32 : i32 to index
    %c0_185 = arith.constant 0 : index
    %c0_186 = arith.constant 0 : index
    %257 = vector.load %arg5[%c0_184, %256, %c0_185, %c0_186] : memref<4x8x8x32xf32, #tpu.memory_space<vmem>>, vector<1x1x8x32xf32>
    %258 = vector.shape_cast %257 : vector<1x1x8x32xf32> to vector<8x32xf32>
    %259 = arith.addf %258, %246 : vector<8x32xf32>
    %260 = arith.negf %259 : vector<8x32xf32>
    %261 = math.exp %260 : vector<8x32xf32>
    %cst_187 = arith.constant 1.000000e+00 : f32
    %262 = vector.broadcast %cst_187 : f32 to vector<8x32xf32>
    %263 = arith.addf %262, %261 : vector<8x32xf32>
    %264 = arith.divf %262, %263 : vector<8x32xf32>
    %c1_188 = arith.constant 1 : index
    %265 = arith.index_cast %c4_i32 : i32 to index
    %c0_189 = arith.constant 0 : index
    %c0_190 = arith.constant 0 : index
    %266 = vector.load %arg5[%c1_188, %265, %c0_189, %c0_190] : memref<4x8x8x32xf32, #tpu.memory_space<vmem>>, vector<1x1x8x32xf32>
    %267 = vector.shape_cast %266 : vector<1x1x8x32xf32> to vector<8x32xf32>
    %268 = arith.addf %267, %249 : vector<8x32xf32>
    %269 = arith.negf %268 : vector<8x32xf32>
    %270 = math.exp %269 : vector<8x32xf32>
    %cst_191 = arith.constant 1.000000e+00 : f32
    %271 = vector.broadcast %cst_191 : f32 to vector<8x32xf32>
    %272 = arith.addf %271, %270 : vector<8x32xf32>
    %273 = arith.divf %271, %272 : vector<8x32xf32>
    %c2_192 = arith.constant 2 : index
    %274 = arith.index_cast %c4_i32 : i32 to index
    %c0_193 = arith.constant 0 : index
    %c0_194 = arith.constant 0 : index
    %275 = vector.load %arg5[%c2_192, %274, %c0_193, %c0_194] : memref<4x8x8x32xf32, #tpu.memory_space<vmem>>, vector<1x1x8x32xf32>
    %276 = vector.shape_cast %275 : vector<1x1x8x32xf32> to vector<8x32xf32>
    %277 = arith.addf %276, %252 : vector<8x32xf32>
    %278 = math.tanh %277 : vector<8x32xf32>
    %c3_195 = arith.constant 3 : index
    %279 = arith.index_cast %c4_i32 : i32 to index
    %c0_196 = arith.constant 0 : index
    %c0_197 = arith.constant 0 : index
    %280 = vector.load %arg5[%c3_195, %279, %c0_196, %c0_197] : memref<4x8x8x32xf32, #tpu.memory_space<vmem>>, vector<1x1x8x32xf32>
    %281 = vector.shape_cast %280 : vector<1x1x8x32xf32> to vector<8x32xf32>
    %282 = arith.addf %281, %255 : vector<8x32xf32>
    %283 = arith.negf %282 : vector<8x32xf32>
    %284 = math.exp %283 : vector<8x32xf32>
    %cst_198 = arith.constant 1.000000e+00 : f32
    %285 = vector.broadcast %cst_198 : f32 to vector<8x32xf32>
    %286 = arith.addf %285, %284 : vector<8x32xf32>
    %287 = arith.divf %285, %286 : vector<8x32xf32>
    %288 = arith.mulf %273, %241 : vector<8x32xf32>
    %289 = arith.mulf %264, %278 : vector<8x32xf32>
    %290 = arith.addf %288, %289 : vector<8x32xf32>
    %291 = math.tanh %290 : vector<8x32xf32>
    %292 = arith.mulf %287, %291 : vector<8x32xf32>
    %c5_i32 = arith.constant 5 : i32
    %c0_199 = arith.constant 0 : index
    %c0_200 = arith.constant 0 : index
    %c0_201 = arith.constant 0 : index
    %293 = vector.load %arg2[%c0_199, %c0_200, %c0_201] : memref<4x32x32xf32, #tpu.memory_space<vmem>>, vector<1x32x32xf32>
    %294 = vector.shape_cast %293 : vector<1x32x32xf32> to vector<32x32xf32>
    %cst_202 = arith.constant dense<0.000000e+00> : vector<8x32xf32>
    %295 = tpu.matmul %292, %294, %cst_202 {dimension_numbers = #tpu.dot_dimension_numbers<[1], [0], [0], [1], [0, 0, 1, 1], [], []>} : vector<8x32xf32>, vector<32x32xf32>, vector<8x32xf32> -> vector<8x32xf32>
    %c1_203 = arith.constant 1 : index
    %c0_204 = arith.constant 0 : index
    %c0_205 = arith.constant 0 : index
    %296 = vector.load %arg2[%c1_203, %c0_204, %c0_205] : memref<4x32x32xf32, #tpu.memory_space<vmem>>, vector<1x32x32xf32>
    %297 = vector.shape_cast %296 : vector<1x32x32xf32> to vector<32x32xf32>
    %cst_206 = arith.constant dense<0.000000e+00> : vector<8x32xf32>
    %298 = tpu.matmul %292, %297, %cst_206 {dimension_numbers = #tpu.dot_dimension_numbers<[1], [0], [0], [1], [0, 0, 1, 1], [], []>} : vector<8x32xf32>, vector<32x32xf32>, vector<8x32xf32> -> vector<8x32xf32>
    %c2_207 = arith.constant 2 : index
    %c0_208 = arith.constant 0 : index
    %c0_209 = arith.constant 0 : index
    %299 = vector.load %arg2[%c2_207, %c0_208, %c0_209] : memref<4x32x32xf32, #tpu.memory_space<vmem>>, vector<1x32x32xf32>
    %300 = vector.shape_cast %299 : vector<1x32x32xf32> to vector<32x32xf32>
    %cst_210 = arith.constant dense<0.000000e+00> : vector<8x32xf32>
    %301 = tpu.matmul %292, %300, %cst_210 {dimension_numbers = #tpu.dot_dimension_numbers<[1], [0], [0], [1], [0, 0, 1, 1], [], []>} : vector<8x32xf32>, vector<32x32xf32>, vector<8x32xf32> -> vector<8x32xf32>
    %c3_211 = arith.constant 3 : index
    %c0_212 = arith.constant 0 : index
    %c0_213 = arith.constant 0 : index
    %302 = vector.load %arg2[%c3_211, %c0_212, %c0_213] : memref<4x32x32xf32, #tpu.memory_space<vmem>>, vector<1x32x32xf32>
    %303 = vector.shape_cast %302 : vector<1x32x32xf32> to vector<32x32xf32>
    %cst_214 = arith.constant dense<0.000000e+00> : vector<8x32xf32>
    %304 = tpu.matmul %292, %303, %cst_214 {dimension_numbers = #tpu.dot_dimension_numbers<[1], [0], [0], [1], [0, 0, 1, 1], [], []>} : vector<8x32xf32>, vector<32x32xf32>, vector<8x32xf32> -> vector<8x32xf32>
    %c0_215 = arith.constant 0 : index
    %305 = arith.index_cast %c5_i32 : i32 to index
    %c0_216 = arith.constant 0 : index
    %c0_217 = arith.constant 0 : index
    %306 = vector.load %arg5[%c0_215, %305, %c0_216, %c0_217] : memref<4x8x8x32xf32, #tpu.memory_space<vmem>>, vector<1x1x8x32xf32>
    %307 = vector.shape_cast %306 : vector<1x1x8x32xf32> to vector<8x32xf32>
    %308 = arith.addf %307, %295 : vector<8x32xf32>
    %309 = arith.negf %308 : vector<8x32xf32>
    %310 = math.exp %309 : vector<8x32xf32>
    %cst_218 = arith.constant 1.000000e+00 : f32
    %311 = vector.broadcast %cst_218 : f32 to vector<8x32xf32>
    %312 = arith.addf %311, %310 : vector<8x32xf32>
    %313 = arith.divf %311, %312 : vector<8x32xf32>
    %c1_219 = arith.constant 1 : index
    %314 = arith.index_cast %c5_i32 : i32 to index
    %c0_220 = arith.constant 0 : index
    %c0_221 = arith.constant 0 : index
    %315 = vector.load %arg5[%c1_219, %314, %c0_220, %c0_221] : memref<4x8x8x32xf32, #tpu.memory_space<vmem>>, vector<1x1x8x32xf32>
    %316 = vector.shape_cast %315 : vector<1x1x8x32xf32> to vector<8x32xf32>
    %317 = arith.addf %316, %298 : vector<8x32xf32>
    %318 = arith.negf %317 : vector<8x32xf32>
    %319 = math.exp %318 : vector<8x32xf32>
    %cst_222 = arith.constant 1.000000e+00 : f32
    %320 = vector.broadcast %cst_222 : f32 to vector<8x32xf32>
    %321 = arith.addf %320, %319 : vector<8x32xf32>
    %322 = arith.divf %320, %321 : vector<8x32xf32>
    %c2_223 = arith.constant 2 : index
    %323 = arith.index_cast %c5_i32 : i32 to index
    %c0_224 = arith.constant 0 : index
    %c0_225 = arith.constant 0 : index
    %324 = vector.load %arg5[%c2_223, %323, %c0_224, %c0_225] : memref<4x8x8x32xf32, #tpu.memory_space<vmem>>, vector<1x1x8x32xf32>
    %325 = vector.shape_cast %324 : vector<1x1x8x32xf32> to vector<8x32xf32>
    %326 = arith.addf %325, %301 : vector<8x32xf32>
    %327 = math.tanh %326 : vector<8x32xf32>
    %c3_226 = arith.constant 3 : index
    %328 = arith.index_cast %c5_i32 : i32 to index
    %c0_227 = arith.constant 0 : index
    %c0_228 = arith.constant 0 : index
    %329 = vector.load %arg5[%c3_226, %328, %c0_227, %c0_228] : memref<4x8x8x32xf32, #tpu.memory_space<vmem>>, vector<1x1x8x32xf32>
    %330 = vector.shape_cast %329 : vector<1x1x8x32xf32> to vector<8x32xf32>
    %331 = arith.addf %330, %304 : vector<8x32xf32>
    %332 = arith.negf %331 : vector<8x32xf32>
    %333 = math.exp %332 : vector<8x32xf32>
    %cst_229 = arith.constant 1.000000e+00 : f32
    %334 = vector.broadcast %cst_229 : f32 to vector<8x32xf32>
    %335 = arith.addf %334, %333 : vector<8x32xf32>
    %336 = arith.divf %334, %335 : vector<8x32xf32>
    %337 = arith.mulf %322, %290 : vector<8x32xf32>
    %338 = arith.mulf %313, %327 : vector<8x32xf32>
    %339 = arith.addf %337, %338 : vector<8x32xf32>
    %340 = math.tanh %339 : vector<8x32xf32>
    %341 = arith.mulf %336, %340 : vector<8x32xf32>
    %c6_i32 = arith.constant 6 : i32
    %c0_230 = arith.constant 0 : index
    %c0_231 = arith.constant 0 : index
    %c0_232 = arith.constant 0 : index
    %342 = vector.load %arg2[%c0_230, %c0_231, %c0_232] : memref<4x32x32xf32, #tpu.memory_space<vmem>>, vector<1x32x32xf32>
    %343 = vector.shape_cast %342 : vector<1x32x32xf32> to vector<32x32xf32>
    %cst_233 = arith.constant dense<0.000000e+00> : vector<8x32xf32>
    %344 = tpu.matmul %341, %343, %cst_233 {dimension_numbers = #tpu.dot_dimension_numbers<[1], [0], [0], [1], [0, 0, 1, 1], [], []>} : vector<8x32xf32>, vector<32x32xf32>, vector<8x32xf32> -> vector<8x32xf32>
    %c1_234 = arith.constant 1 : index
    %c0_235 = arith.constant 0 : index
    %c0_236 = arith.constant 0 : index
    %345 = vector.load %arg2[%c1_234, %c0_235, %c0_236] : memref<4x32x32xf32, #tpu.memory_space<vmem>>, vector<1x32x32xf32>
    %346 = vector.shape_cast %345 : vector<1x32x32xf32> to vector<32x32xf32>
    %cst_237 = arith.constant dense<0.000000e+00> : vector<8x32xf32>
    %347 = tpu.matmul %341, %346, %cst_237 {dimension_numbers = #tpu.dot_dimension_numbers<[1], [0], [0], [1], [0, 0, 1, 1], [], []>} : vector<8x32xf32>, vector<32x32xf32>, vector<8x32xf32> -> vector<8x32xf32>
    %c2_238 = arith.constant 2 : index
    %c0_239 = arith.constant 0 : index
    %c0_240 = arith.constant 0 : index
    %348 = vector.load %arg2[%c2_238, %c0_239, %c0_240] : memref<4x32x32xf32, #tpu.memory_space<vmem>>, vector<1x32x32xf32>
    %349 = vector.shape_cast %348 : vector<1x32x32xf32> to vector<32x32xf32>
    %cst_241 = arith.constant dense<0.000000e+00> : vector<8x32xf32>
    %350 = tpu.matmul %341, %349, %cst_241 {dimension_numbers = #tpu.dot_dimension_numbers<[1], [0], [0], [1], [0, 0, 1, 1], [], []>} : vector<8x32xf32>, vector<32x32xf32>, vector<8x32xf32> -> vector<8x32xf32>
    %c3_242 = arith.constant 3 : index
    %c0_243 = arith.constant 0 : index
    %c0_244 = arith.constant 0 : index
    %351 = vector.load %arg2[%c3_242, %c0_243, %c0_244] : memref<4x32x32xf32, #tpu.memory_space<vmem>>, vector<1x32x32xf32>
    %352 = vector.shape_cast %351 : vector<1x32x32xf32> to vector<32x32xf32>
    %cst_245 = arith.constant dense<0.000000e+00> : vector<8x32xf32>
    %353 = tpu.matmul %341, %352, %cst_245 {dimension_numbers = #tpu.dot_dimension_numbers<[1], [0], [0], [1], [0, 0, 1, 1], [], []>} : vector<8x32xf32>, vector<32x32xf32>, vector<8x32xf32> -> vector<8x32xf32>
    %c0_246 = arith.constant 0 : index
    %354 = arith.index_cast %c6_i32 : i32 to index
    %c0_247 = arith.constant 0 : index
    %c0_248 = arith.constant 0 : index
    %355 = vector.load %arg5[%c0_246, %354, %c0_247, %c0_248] : memref<4x8x8x32xf32, #tpu.memory_space<vmem>>, vector<1x1x8x32xf32>
    %356 = vector.shape_cast %355 : vector<1x1x8x32xf32> to vector<8x32xf32>
    %357 = arith.addf %356, %344 : vector<8x32xf32>
    %358 = arith.negf %357 : vector<8x32xf32>
    %359 = math.exp %358 : vector<8x32xf32>
    %cst_249 = arith.constant 1.000000e+00 : f32
    %360 = vector.broadcast %cst_249 : f32 to vector<8x32xf32>
    %361 = arith.addf %360, %359 : vector<8x32xf32>
    %362 = arith.divf %360, %361 : vector<8x32xf32>
    %c1_250 = arith.constant 1 : index
    %363 = arith.index_cast %c6_i32 : i32 to index
    %c0_251 = arith.constant 0 : index
    %c0_252 = arith.constant 0 : index
    %364 = vector.load %arg5[%c1_250, %363, %c0_251, %c0_252] : memref<4x8x8x32xf32, #tpu.memory_space<vmem>>, vector<1x1x8x32xf32>
    %365 = vector.shape_cast %364 : vector<1x1x8x32xf32> to vector<8x32xf32>
    %366 = arith.addf %365, %347 : vector<8x32xf32>
    %367 = arith.negf %366 : vector<8x32xf32>
    %368 = math.exp %367 : vector<8x32xf32>
    %cst_253 = arith.constant 1.000000e+00 : f32
    %369 = vector.broadcast %cst_253 : f32 to vector<8x32xf32>
    %370 = arith.addf %369, %368 : vector<8x32xf32>
    %371 = arith.divf %369, %370 : vector<8x32xf32>
    %c2_254 = arith.constant 2 : index
    %372 = arith.index_cast %c6_i32 : i32 to index
    %c0_255 = arith.constant 0 : index
    %c0_256 = arith.constant 0 : index
    %373 = vector.load %arg5[%c2_254, %372, %c0_255, %c0_256] : memref<4x8x8x32xf32, #tpu.memory_space<vmem>>, vector<1x1x8x32xf32>
    %374 = vector.shape_cast %373 : vector<1x1x8x32xf32> to vector<8x32xf32>
    %375 = arith.addf %374, %350 : vector<8x32xf32>
    %376 = math.tanh %375 : vector<8x32xf32>
    %c3_257 = arith.constant 3 : index
    %377 = arith.index_cast %c6_i32 : i32 to index
    %c0_258 = arith.constant 0 : index
    %c0_259 = arith.constant 0 : index
    %378 = vector.load %arg5[%c3_257, %377, %c0_258, %c0_259] : memref<4x8x8x32xf32, #tpu.memory_space<vmem>>, vector<1x1x8x32xf32>
    %379 = vector.shape_cast %378 : vector<1x1x8x32xf32> to vector<8x32xf32>
    %380 = arith.addf %379, %353 : vector<8x32xf32>
    %381 = arith.negf %380 : vector<8x32xf32>
    %382 = math.exp %381 : vector<8x32xf32>
    %cst_260 = arith.constant 1.000000e+00 : f32
    %383 = vector.broadcast %cst_260 : f32 to vector<8x32xf32>
    %384 = arith.addf %383, %382 : vector<8x32xf32>
    %385 = arith.divf %383, %384 : vector<8x32xf32>
    %386 = arith.mulf %371, %339 : vector<8x32xf32>
    %387 = arith.mulf %362, %376 : vector<8x32xf32>
    %388 = arith.addf %386, %387 : vector<8x32xf32>
    %389 = math.tanh %388 : vector<8x32xf32>
    %390 = arith.mulf %385, %389 : vector<8x32xf32>
    %c7_i32 = arith.constant 7 : i32
    %c0_261 = arith.constant 0 : index
    %c0_262 = arith.constant 0 : index
    %c0_263 = arith.constant 0 : index
    %391 = vector.load %arg2[%c0_261, %c0_262, %c0_263] : memref<4x32x32xf32, #tpu.memory_space<vmem>>, vector<1x32x32xf32>
    %392 = vector.shape_cast %391 : vector<1x32x32xf32> to vector<32x32xf32>
    %cst_264 = arith.constant dense<0.000000e+00> : vector<8x32xf32>
    %393 = tpu.matmul %390, %392, %cst_264 {dimension_numbers = #tpu.dot_dimension_numbers<[1], [0], [0], [1], [0, 0, 1, 1], [], []>} : vector<8x32xf32>, vector<32x32xf32>, vector<8x32xf32> -> vector<8x32xf32>
    %c1_265 = arith.constant 1 : index
    %c0_266 = arith.constant 0 : index
    %c0_267 = arith.constant 0 : index
    %394 = vector.load %arg2[%c1_265, %c0_266, %c0_267] : memref<4x32x32xf32, #tpu.memory_space<vmem>>, vector<1x32x32xf32>
    %395 = vector.shape_cast %394 : vector<1x32x32xf32> to vector<32x32xf32>
    %cst_268 = arith.constant dense<0.000000e+00> : vector<8x32xf32>
    %396 = tpu.matmul %390, %395, %cst_268 {dimension_numbers = #tpu.dot_dimension_numbers<[1], [0], [0], [1], [0, 0, 1, 1], [], []>} : vector<8x32xf32>, vector<32x32xf32>, vector<8x32xf32> -> vector<8x32xf32>
    %c2_269 = arith.constant 2 : index
    %c0_270 = arith.constant 0 : index
    %c0_271 = arith.constant 0 : index
    %397 = vector.load %arg2[%c2_269, %c0_270, %c0_271] : memref<4x32x32xf32, #tpu.memory_space<vmem>>, vector<1x32x32xf32>
    %398 = vector.shape_cast %397 : vector<1x32x32xf32> to vector<32x32xf32>
    %cst_272 = arith.constant dense<0.000000e+00> : vector<8x32xf32>
    %399 = tpu.matmul %390, %398, %cst_272 {dimension_numbers = #tpu.dot_dimension_numbers<[1], [0], [0], [1], [0, 0, 1, 1], [], []>} : vector<8x32xf32>, vector<32x32xf32>, vector<8x32xf32> -> vector<8x32xf32>
    %c3_273 = arith.constant 3 : index
    %c0_274 = arith.constant 0 : index
    %c0_275 = arith.constant 0 : index
    %400 = vector.load %arg2[%c3_273, %c0_274, %c0_275] : memref<4x32x32xf32, #tpu.memory_space<vmem>>, vector<1x32x32xf32>
    %401 = vector.shape_cast %400 : vector<1x32x32xf32> to vector<32x32xf32>
    %cst_276 = arith.constant dense<0.000000e+00> : vector<8x32xf32>
    %402 = tpu.matmul %390, %401, %cst_276 {dimension_numbers = #tpu.dot_dimension_numbers<[1], [0], [0], [1], [0, 0, 1, 1], [], []>} : vector<8x32xf32>, vector<32x32xf32>, vector<8x32xf32> -> vector<8x32xf32>
    %c0_277 = arith.constant 0 : index
    %403 = arith.index_cast %c7_i32 : i32 to index
    %c0_278 = arith.constant 0 : index
    %c0_279 = arith.constant 0 : index
    %404 = vector.load %arg5[%c0_277, %403, %c0_278, %c0_279] : memref<4x8x8x32xf32, #tpu.memory_space<vmem>>, vector<1x1x8x32xf32>
    %405 = vector.shape_cast %404 : vector<1x1x8x32xf32> to vector<8x32xf32>
    %406 = arith.addf %405, %393 : vector<8x32xf32>
    %407 = arith.negf %406 : vector<8x32xf32>
    %408 = math.exp %407 : vector<8x32xf32>
    %cst_280 = arith.constant 1.000000e+00 : f32
    %409 = vector.broadcast %cst_280 : f32 to vector<8x32xf32>
    %410 = arith.addf %409, %408 : vector<8x32xf32>
    %411 = arith.divf %409, %410 : vector<8x32xf32>
    %c1_281 = arith.constant 1 : index
    %412 = arith.index_cast %c7_i32 : i32 to index
    %c0_282 = arith.constant 0 : index
    %c0_283 = arith.constant 0 : index
    %413 = vector.load %arg5[%c1_281, %412, %c0_282, %c0_283] : memref<4x8x8x32xf32, #tpu.memory_space<vmem>>, vector<1x1x8x32xf32>
    %414 = vector.shape_cast %413 : vector<1x1x8x32xf32> to vector<8x32xf32>
    %415 = arith.addf %414, %396 : vector<8x32xf32>
    %416 = arith.negf %415 : vector<8x32xf32>
    %417 = math.exp %416 : vector<8x32xf32>
    %cst_284 = arith.constant 1.000000e+00 : f32
    %418 = vector.broadcast %cst_284 : f32 to vector<8x32xf32>
    %419 = arith.addf %418, %417 : vector<8x32xf32>
    %420 = arith.divf %418, %419 : vector<8x32xf32>
    %c2_285 = arith.constant 2 : index
    %421 = arith.index_cast %c7_i32 : i32 to index
    %c0_286 = arith.constant 0 : index
    %c0_287 = arith.constant 0 : index
    %422 = vector.load %arg5[%c2_285, %421, %c0_286, %c0_287] : memref<4x8x8x32xf32, #tpu.memory_space<vmem>>, vector<1x1x8x32xf32>
    %423 = vector.shape_cast %422 : vector<1x1x8x32xf32> to vector<8x32xf32>
    %424 = arith.addf %423, %399 : vector<8x32xf32>
    %425 = math.tanh %424 : vector<8x32xf32>
    %c3_288 = arith.constant 3 : index
    %426 = arith.index_cast %c7_i32 : i32 to index
    %c0_289 = arith.constant 0 : index
    %c0_290 = arith.constant 0 : index
    %427 = vector.load %arg5[%c3_288, %426, %c0_289, %c0_290] : memref<4x8x8x32xf32, #tpu.memory_space<vmem>>, vector<1x1x8x32xf32>
    %428 = vector.shape_cast %427 : vector<1x1x8x32xf32> to vector<8x32xf32>
    %429 = arith.addf %428, %402 : vector<8x32xf32>
    %430 = arith.negf %429 : vector<8x32xf32>
    %431 = math.exp %430 : vector<8x32xf32>
    %cst_291 = arith.constant 1.000000e+00 : f32
    %432 = vector.broadcast %cst_291 : f32 to vector<8x32xf32>
    %433 = arith.addf %432, %431 : vector<8x32xf32>
    %434 = arith.divf %432, %433 : vector<8x32xf32>
    %435 = arith.mulf %420, %388 : vector<8x32xf32>
    %436 = arith.mulf %411, %425 : vector<8x32xf32>
    %437 = arith.addf %435, %436 : vector<8x32xf32>
    %438 = math.tanh %437 : vector<8x32xf32>
    %439 = arith.mulf %434, %438 : vector<8x32xf32>
    %c8_i32 = arith.constant 8 : i32
    %c0_292 = arith.constant 0 : index
    %c0_293 = arith.constant 0 : index
    %440 = vector.load %arg4[%c0_292, %c0_293] : memref<8x32xf32, #tpu.memory_space<vmem>>, vector<8x32xf32>
    tpu.vector_store %arg4[%c0_292, %c0_293], %439 {strides = array<i32>} : memref<8x32xf32, #tpu.memory_space<vmem>>, vector<8x32xf32>,
    return
  }
}

</mosaic_0001>

<bundles_post_ra>
// kernel: simple_lstm_glove_forward.1
= control target key start
LH: loop header
LB: loop body
LE: loop exit
PB: predicated region body
PF: predicated region fallthrough
CT: control target
= control target key end

     0   :  { %vm36_vm0 = vcmask 261120   ;;  %v4237_v31 = vmov 0.0|0.0   ;;  %vm4238_vm1 = vmmov 0   ;;  %v4239_v49 = vmov 0.0   ;;  %s4735_s1 = inlined_call_operand.vmem [shape: f32[4,32,32], index: 1, kind: input, shape index: {}]   ;;  %s4736_s0 = inlined_call_operand.vmem [shape: f32[8,8,32], index: 0, kind: input, shape index: {}]   ;;  %s4737_s2 = inlined_call_operand.vmem [shape: f32[4,32,32], index: 2, kind: input, shape index: {}]   ;;  %s4738_s3 = inlined_call_operand.vmem [shape: f32[4,1,32], index: 3, kind: input, shape index: {}]   ;;  %s4739_s4 = inlined_call_operand.vmem [shape: f32[8,32], index: 4, kind: output, shape index: {}]  }
   0x1   :  { %v25_v0 = vld [vmem:[%s4735_s1] sm:$0xff]  ;;  %v26_v1 = vld [vmem:[%s4735_s1 + $0x8] sm:$0xff]  ;;  %v27_v5 = vld [vmem:[%s4735_s1 + $0x10] sm:$0xff] }
   0x2   :  { %v3136_v2 = vld [vmem:[%s4735_s1 + $0x20] sm:$0xff]  ;;  %v3882_v3 = vpack.c.bf16 %v26_v1, %v25_v0  ;;  %v3137_v4 = vld [vmem:[%s4735_s1 + $0x28] sm:$0xff]  ;;  %v28_v6 = vld [vmem:[%s4735_s1 + $0x18] sm:$0xff] }
   0x3   :  { %v3890_v7 = vpack.c.bf16 %v3137_v4, %v3136_v2  ;;  %v3886_v8 = vpack.c.bf16 %v28_v6, %v27_v5  ;;  %v3138_v9 = vld [vmem:[%s4735_s1 + $0x30] sm:$0xff]  ;;  %v3139_v10 = vld [vmem:[%s4735_s1 + $0x38] sm:$0xff]  ;;  %v4292_v11 = vld [vmem:[%s4736_s0] sm:$0xff] }
   0x4   :  { %3883 = vmatprep.subr.bf16.mxu0 %v3882_v3  ;;  %v3894_v12 = vpack.c.bf16 %v3139_v10, %v3138_v9  ;;  %3458 = vmatprep.mubr.msk.f32.mxu0 %vm36_vm0, %v4292_v11  ;;  %v3150_v13 = vld [vmem:[%s4735_s1 + $0x40] sm:$0xff]  ;;  %v3151_v14 = vld [vmem:[%s4735_s1 + $0x48] sm:$0xff]  ;;  %v3152_v19 = vld [vmem:[%s4735_s1 + $0x50] sm:$0xff] }
   0x5   :  { %3891 = vmatprep.subr.bf16.mxu1 %v3890_v7  ;;  %3885 = vmatpush3.bf16.msra.mxu0 %v3882_v3  ;;  %v3164_v15 = vld [vmem:[%s4735_s1 + $0x60] sm:$0xff]  ;;  %v3165_v16 = vld [vmem:[%s4735_s1 + $0x68] sm:$0xff]  ;;  %v3898_v17 = vpack.c.bf16 %v3151_v14, %v3150_v13  ;;  %v3153_v20 = vld [vmem:[%s4735_s1 + $0x58] sm:$0xff] }
   0x6   :  { %3893 = vmatpush3.bf16.msra.mxu1 %v3890_v7  ;;  %3887 = vmatprep.subr.bf16.mxu0 %v3886_v8  ;;  %v3906_v18 = vpack.c.bf16 %v3165_v16, %v3164_v15  ;;  %v18_v21 = vld [vmem:[%s4736_s0 + $0x8] sm:$0xff]  ;;  %v3166_v22 = vld [vmem:[%s4735_s1 + $0x70] sm:$0xff]  ;;  %v3167_v23 = vld [vmem:[%s4735_s1 + $0x78] sm:$0xff]  ;;  %v3902_v25 = vpack.c.bf16 %v3153_v20, %v3152_v19 }
   0x7   :  { %3895 = vmatprep.subr.bf16.mxu1 %v3894_v12  ;;  %3478 = vmatprep.mubr.msk.f32.mxu1 %vm36_vm0, %v4292_v11  ;;  %v19_v24 = vld [vmem:[%s4736_s0 + $0x10] sm:$0xff]  ;;  %v3910_v26 = vpack.c.bf16 %v3167_v23, %v3166_v22  ;;  %v20_v27 = vld [vmem:[%s4736_s0 + $0x18] sm:$0xff]  ;;  %v21_v28 = vld [vmem:[%s4736_s0 + $0x20] sm:$0xff] }
   0x8   :  { %v22_v29 = vld [vmem:[%s4736_s0 + $0x28] sm:$0xff]  ;;  %v23_v30 = vld [vmem:[%s4736_s0 + $0x30] sm:$0xff]  ;;  %v24_v32 = vld [vmem:[%s4736_s0 + $0x38] sm:$0xff] }
   0x9   :  { %3889 = vmatpush3.bf16.msra.mxu0 %v3886_v8  ;;  %v555_v33 = vld [vmem:[%s4737_s2] sm:$0xff]  ;;  %v556_v34 = vld [vmem:[%s4737_s2 + $0x8] sm:$0xff]  ;;  %v557_v39 = vld [vmem:[%s4737_s2 + $0x10] sm:$0xff] }
   0xa   :  { %3897 = vmatpush3.bf16.msra.mxu1 %v3894_v12  ;;  %3899 = vmatprep.subr.bf16.mxu0 %v3898_v17  ;;  %v3178_v35 = vld [vmem:[%s4737_s2 + $0x20] sm:$0xff]  ;;  %v3179_v36 = vld [vmem:[%s4737_s2 + $0x28] sm:$0xff]  ;;  %v4373_v37 = vpack.c.bf16 %v556_v34, %v555_v33  ;;  %v558_v40 = vld [vmem:[%s4737_s2 + $0x18] sm:$0xff] }
   0xb   :  { %3907 = vmatprep.subr.bf16.mxu1 %v3906_v18  ;;  %v4377_v38 = vpack.c.bf16 %v3179_v36, %v3178_v35  ;;  %v3180_v41 = vld [vmem:[%s4737_s2 + $0x30] sm:$0xff]  ;;  %v3181_v42 = vld [vmem:[%s4737_s2 + $0x38] sm:$0xff]  ;;  %v4396_v43 = vpack.c.bf16 %v558_v40, %v557_v39  ;;  %v3182_v45 = vld [vmem:[%s4737_s2 + $0x40] sm:$0xff] }
   0xc   :  { %3459 = vmatmul.mubr.msk.f32.vlgmr.msra.gmra.mrb[0].mxu0 %vm36_vm0, %v18_v21  ;;  %v4400_v44 = vpack.c.bf16 %v3181_v42, %v3180_v41  ;;  %v3183_v46 = vld [vmem:[%s4737_s2 + $0x48] sm:$0xff]  ;;  %v3186_v47 = vld [vmem:[%s4737_s2 + $0x60] sm:$0xff]  ;;  %v3184_v52 = vld [vmem:[%s4737_s2 + $0x50] sm:$0xff] }
   0xd   :  { %3479 = vmatmul.mubr.msk.f32.vlgmr.msra.gmra.mrb[0].mxu1 %vm36_vm0, %v18_v21  ;;  %3901 = vmatpush3.bf16.msra.mxu0 %v3898_v17  ;;  %v3187_v48 = vld [vmem:[%s4737_s2 + $0x68] sm:$0xff]  ;;  %v4431_v50 = vpack.c.bf16 %v3183_v46, %v3182_v45  ;;  %v3185_v53 = vld [vmem:[%s4737_s2 + $0x58] sm:$0xff]  ;;  %v3188_v54 = vld [vmem:[%s4737_s2 + $0x70] sm:$0xff] }
   0xe   :  { %3909 = vmatpush3.bf16.msra.mxu1 %v3906_v18  ;;  %3461 = vmatprep.mubr.msk.f32.mxu0 %vm36_vm0, %v19_v24  ;;  %v4435_v51 = vpack.c.bf16 %v3187_v48, %v3186_v47  ;;  %v3189_v55 = vld [vmem:[%s4737_s2 + $0x78] sm:$0xff]  ;;  %v4452_v56 = vpack.c.bf16 %v3185_v53, %v3184_v52  ;;  %v3127_v58 = vld [vmem:[%s4738_s3] ss:$0 sm:$0xff]  ;;  %v3141_v59 = vld [vmem:[%s4738_s3 + $0x1] ss:$0 sm:$0xff] }
   0xf   :  { %3481 = vmatprep.mubr.msk.f32.mxu1 %vm36_vm0, %v19_v24  ;;  %3903 = vmatprep.subr.bf16.mxu0 %v3902_v25  ;;  %v4456_v57 = vpack.c.bf16 %v3189_v55, %v3188_v54 }
  0x10   :  { %3462 = vmatmul.mubr.msk.f32.gmra.mrb[2].mxu0 %vm36_vm0, %v20_v27  ;;  %3911 = vmatprep.subr.bf16.mxu1 %v3910_v26 }
  0x11   :  { %3482 = vmatmul.mubr.msk.f32.gmra.mrb[2].mxu1 %vm36_vm0, %v20_v27  ;;  %3464 = vmatprep.mubr.msk.f32.mxu0 %vm36_vm0, %v21_v28 }
  0x12   :  { %3484 = vmatprep.mubr.msk.f32.mxu1 %vm36_vm0, %v21_v28  ;;  %3905 = vmatpush3.bf16.msra.mxu0 %v3902_v25 }
  0x13   :  { %3913 = vmatpush3.bf16.msra.mxu1 %v3910_v26  ;;  %3914 = vmatprep.subr.bf16.mxu0 %v4237_v31 }
  0x14   :  { %3465 = vmatmul.mubr.msk.f32.gmra.mrb[4].mxu0 %vm36_vm0, %v22_v29  ;;  %3920 = vmatprep.subr.bf16.mxu1 %v4237_v31 }
  0x15   :  { %3485 = vmatmul.mubr.msk.f32.gmra.mrb[4].mxu1 %vm36_vm0, %v22_v29  ;;  %3467 = vmatprep.mubr.msk.f32.mxu0 %vm36_vm0, %v23_v30 }
  0x16   :  { %3487 = vmatprep.mubr.msk.f32.mxu1 %vm36_vm0, %v23_v30 }
  0x18   :  { %3468 = vmatmul.mubr.msk.f32.gmra.mrb[6].mxu0 %vm36_vm0, %v24_v32 }
  0x19   :  { %3488 = vmatmul.mubr.msk.f32.gmra.mrb[6].mxu1 %vm36_vm0, %v24_v32  ;;  %3498 = vmatprep.mubr.msk.f32.mxu0 %vm36_vm0, %v4292_v11 }
  0x1a   :  { %3518 = vmatprep.mubr.msk.f32.mxu1 %vm36_vm0, %v4292_v11 }
  0x1c   :  { %3499 = vmatmul.mubr.msk.f32.vlgmr.msra.gmra.mrb[8].mxu0 %vm36_vm0, %v18_v21 }
  0x1d   :  { %3519 = vmatmul.mubr.msk.f32.vlgmr.msra.gmra.mrb[8].mxu1 %vm36_vm0, %v18_v21  ;;  %3916 = vmatpush3.bf16.msra.mxu0 %v4373_v37 }
  0x1e   :  { %3922 = vmatpush3.bf16.msra.mxu1 %v4377_v38  ;;  %3501 = vmatprep.mubr.msk.f32.mxu0 %vm36_vm0, %v19_v24 }
  0x1f   :  { %3521 = vmatprep.mubr.msk.f32.mxu1 %vm36_vm0, %v19_v24  ;;  %3917 = vmatprep.subr.bf16.mxu0 %v4237_v31 }
  0x20   :  { %3502 = vmatmul.mubr.msk.f32.gmra.mrb[10].mxu0 %vm36_vm0, %v20_v27  ;;  %3923 = vmatprep.subr.bf16.mxu1 %v4237_v31 }
  0x21   :  { %3522 = vmatmul.mubr.msk.f32.gmra.mrb[10].mxu1 %vm36_vm0, %v20_v27  ;;  %3504 = vmatprep.mubr.msk.f32.mxu0 %vm36_vm0, %v21_v28  ;;  %v3155_v27 = vld [vmem:[%s4738_s3 + $0x2] ss:$0 sm:$0xff] }
  0x22   :  { %3524 = vmatprep.mubr.msk.f32.mxu1 %vm36_vm0, %v21_v28  ;;  %3919 = vmatpush3.bf16.msra.mxu0 %v4396_v43 }
  0x23   :  { %3925 = vmatpush3.bf16.msra.mxu1 %v4400_v44  ;;  %3926 = vmatprep.subr.bf16.mxu0 %v4237_v31 }
  0x24   :  { %3505 = vmatmul.mubr.msk.f32.gmra.mrb[12].mxu0 %vm36_vm0, %v22_v29  ;;  %3932 = vmatprep.subr.bf16.mxu1 %v4237_v31 }
  0x25   :  { %3525 = vmatmul.mubr.msk.f32.gmra.mrb[12].mxu1 %vm36_vm0, %v22_v29  ;;  %3507 = vmatprep.mubr.msk.f32.mxu0 %vm36_vm0, %v23_v30  ;;  %v3169_v29 = vld [vmem:[%s4738_s3 + $0x3] ss:$0 sm:$0xff] }
  0x26   :  { %3527 = vmatprep.mubr.msk.f32.mxu1 %vm36_vm0, %v23_v30 }
  0x28   :  { %3508 = vmatmul.mubr.msk.f32.gmra.mrb[14].mxu0 %vm36_vm0, %v24_v32 }
  0x29   :  { %3528 = vmatmul.mubr.msk.f32.gmra.mrb[14].mxu1 %vm36_vm0, %v24_v32  ;;  %3538 = vmatprep.mubr.msk.f32.mxu0 %vm4238_vm1, %v4239_v49 }
  0x2a   :  { %3549 = vmatprep.mubr.msk.f32.mxu1 %vm4238_vm1, %v4239_v49 }
  0x2c   :  { %3539 = vmatmul.mubr.f32.vlgmr.msra.gmra.mrb[16].mxu0 %v4239_v49 }
  0x2d   :  { %3550 = vmatmul.mubr.f32.vlgmr.msra.gmra.mrb[16].mxu1 %v4239_v49  ;;  %3928 = vmatpush3.bf16.msra.mxu0 %v4431_v50 }
  0x2e   :  { %3934 = vmatpush3.bf16.msra.mxu1 %v4435_v51  ;;  %3929 = vmatprep.subr.bf16.mxu0 %v4237_v31 }
  0x2f   :  { %3935 = vmatprep.subr.bf16.mxu1 %v4237_v31  ;;  %3560 = vmatprep.mubr.msk.f32.mxu0 %vm4238_vm1, %v4239_v49 }
  0x30   :  { %3571 = vmatprep.mubr.msk.f32.mxu1 %vm4238_vm1, %v4239_v49 }
  0x31   :  { %3931 = vmatpush3.bf16.msra.mxu0 %v4452_v56 }
  0x32   :  { %3937 = vmatpush3.bf16.msra.mxu1 %v4456_v57  ;;  %3938 = vmatprep.subr.bf16.mxu0 %v4237_v31 }
  0x33   :  { %3944 = vmatprep.subr.bf16.mxu1 %v4237_v31 }
  0x34   :  { %3561 = vmatmul.mubr.f32.vlgmr.msra.gmra.mrb[18].mxu0 %v4239_v49 }
  0x35   :  { %3572 = vmatmul.mubr.f32.vlgmr.msra.gmra.mrb[18].mxu1 %v4239_v49  ;;  %3940 = vmatpush3.bf16.msra.mxu0 %v4373_v37 }
  0x36   :  { %3946 = vmatpush3.bf16.msra.mxu1 %v4377_v38  ;;  %3941 = vmatprep.subr.bf16.mxu0 %v4237_v31 }
  0x37   :  { %3947 = vmatprep.subr.bf16.mxu1 %v4237_v31  ;;  %3582 = vmatprep.mubr.msk.f32.mxu0 %vm4238_vm1, %v4239_v49 }
  0x38   :  { %3593 = vmatprep.mubr.msk.f32.mxu1 %vm4238_vm1, %v4239_v49 }
  0x39   :  { %3943 = vmatpush3.bf16.msra.mxu0 %v4396_v43 }
  0x3a   :  { %3949 = vmatpush3.bf16.msra.mxu1 %v4400_v44  ;;  %3950 = vmatprep.subr.bf16.mxu0 %v4237_v31 }
  0x3b   :  { %3956 = vmatprep.subr.bf16.mxu1 %v4237_v31 }
  0xdf   :  { %v3460_v60 = vpop.f32.mrb[0].mxu0 }
  0xe0   :  { %v133_v61 = vadd.f32 %v3460_v60, %v3127_v58  ;;  %v3480_v62 = vpop.f32.mrb[0].mxu1  ;;  %v127_v63 = vpop.f32.mrb[1].mxu0 }
  0xe1   :  { %v259_v0 = vadd.f32 %v3480_v62, %v3141_v59  ;;  %v128_v1 = vadd.f32 %v3127_v58, %v127_v63  ;;  %v253_v2 = vpop.f32.mrb[1].mxu1 }
  0xe2   :  { %167 = vst.msk [vmem:[#allocation2 + $0x8] sm:$0xff] %vm36_vm0, %v133_v61  ;;  %v254_v3 = vadd.f32 %v3141_v59, %v253_v2 }
  0xe3   :  { %294 = vst.msk [vmem:[#allocation2 + $0x48] sm:$0xff] %vm36_vm0, %v259_v0  ;;  %166 = vst.msk [vmem:[#allocation2] sm:$0xff] %vm36_vm0, %v128_v1  ;;  %v3463_v4 = vpop.f32.mrb[2].mxu0 }
  0xe4   :  { %293 = vst.msk [vmem:[#allocation2 + $0x40] sm:$0xff] %vm36_vm0, %v254_v3  ;;  %v143_v5 = vadd.f32 %v3463_v4, %v3127_v58  ;;  %v3483_v6 = vpop.f32.mrb[2].mxu1  ;;  %v137_v7 = vpop.f32.mrb[3].mxu0 }
  0xe5   :  { %v269_v8 = vadd.f32 %v3483_v6, %v3141_v59  ;;  %v138_v9 = vadd.f32 %v3127_v58, %v137_v7  ;;  %v263_v10 = vpop.f32.mrb[3].mxu1 }
  0xe6   :  { %169 = vst.msk [vmem:[#allocation2 + $0x18] sm:$0xff] %vm36_vm0, %v143_v5  ;;  %v264_v11 = vadd.f32 %v3141_v59, %v263_v10 }
  0xe7   :  { %296 = vst.msk [vmem:[#allocation2 + $0x58] sm:$0xff] %vm36_vm0, %v269_v8  ;;  %168 = vst.msk [vmem:[#allocation2 + $0x10] sm:$0xff] %vm36_vm0, %v138_v9  ;;  %v3466_v12 = vpop.f32.mrb[4].mxu0 }
  0xe8   :  { %295 = vst.msk [vmem:[#allocation2 + $0x50] sm:$0xff] %vm36_vm0, %v264_v11  ;;  %v153_v13 = vadd.f32 %v3466_v12, %v3127_v58  ;;  %v3486_v14 = vpop.f32.mrb[4].mxu1  ;;  %v147_v15 = vpop.f32.mrb[5].mxu0 }
  0xe9   :  { %v279_v16 = vadd.f32 %v3486_v14, %v3141_v59  ;;  %v148_v17 = vadd.f32 %v3127_v58, %v147_v15  ;;  %v273_v18 = vpop.f32.mrb[5].mxu1 }
  0xea   :  { %171 = vst.msk [vmem:[#allocation2 + $0x28] sm:$0xff] %vm36_vm0, %v153_v13  ;;  %v274_v19 = vadd.f32 %v3141_v59, %v273_v18  ;;  %v857_v9 = vld [vmem:[#allocation2] sm:$0xff] }
  0xeb   :  { %298 = vst.msk [vmem:[#allocation2 + $0x68] sm:$0xff] %vm36_vm0, %v279_v16  ;;  %170 = vst.msk [vmem:[#allocation2 + $0x20] sm:$0xff] %vm36_vm0, %v148_v17  ;;  %v3469_v20 = vpop.f32.mrb[6].mxu0  ;;  %v865_v12 = vld [vmem:[#allocation2 + $0x40] sm:$0xff] }
  0xec   :  { %297 = vst.msk [vmem:[#allocation2 + $0x60] sm:$0xff] %vm36_vm0, %v274_v19  ;;  %v163_v21 = vadd.f32 %v3469_v20, %v3127_v58  ;;  %v3489_v22 = vpop.f32.mrb[6].mxu1  ;;  %v157_v23 = vpop.f32.mrb[7].mxu0 }
  0xed   :  { %v289_v24 = vadd.f32 %v3489_v22, %v3141_v59  ;;  %v158_v25 = vadd.f32 %v3127_v58, %v157_v23  ;;  %v283_v26 = vpop.f32.mrb[7].mxu1 }
  0xee   :  { %173 = vst.msk [vmem:[#allocation2 + $0x38] sm:$0xff] %vm36_vm0, %v163_v21  ;;  %v284_v28 = vadd.f32 %v3141_v59, %v283_v26 }
  0xef   :  { %300 = vst.msk [vmem:[#allocation2 + $0x78] sm:$0xff] %vm36_vm0, %v289_v24  ;;  %172 = vst.msk [vmem:[#allocation2 + $0x30] sm:$0xff] %vm36_vm0, %v158_v25  ;;  %v3500_v30 = vpop.f32.mrb[8].mxu0 }
  0xf0   :  { %299 = vst.msk [vmem:[#allocation2 + $0x70] sm:$0xff] %vm36_vm0, %v284_v28  ;;  %v386_v32 = vadd.f32 %v3500_v30, %v3155_v27  ;;  %v3520_v33 = vpop.f32.mrb[8].mxu1  ;;  %v380_v34 = vpop.f32.mrb[9].mxu0 }
  0xf1   :  { %v513_v35 = vadd.f32 %v3520_v33, %v3169_v29  ;;  %v381_v36 = vadd.f32 %v3155_v27, %v380_v34  ;;  %v507_v39 = vpop.f32.mrb[9].mxu1 }
  0xf2   :  { %421 = vst.msk [vmem:[#allocation2 + $0x88] sm:$0xff] %vm36_vm0, %v386_v32  ;;  %v508_v40 = vadd.f32 %v3169_v29, %v507_v39 }
  0xf3   :  { %548 = vst.msk [vmem:[#allocation2 + $0xc8] sm:$0xff] %vm36_vm0, %v513_v35  ;;  %420 = vst.msk [vmem:[#allocation2 + $0x80] sm:$0xff] %vm36_vm0, %v381_v36  ;;  %v3503_v41 = vpop.f32.mrb[10].mxu0 }
  0xf4   :  { %547 = vst.msk [vmem:[#allocation2 + $0xc0] sm:$0xff] %vm36_vm0, %v508_v40  ;;  %v396_v42 = vadd.f32 %v3503_v41, %v3155_v27  ;;  %v3523_v45 = vpop.f32.mrb[10].mxu1  ;;  %v390_v46 = vpop.f32.mrb[11].mxu0 }
  0xf5   :  { %v523_v47 = vadd.f32 %v3523_v45, %v3169_v29  ;;  %v391_v48 = vadd.f32 %v3155_v27, %v390_v46  ;;  %v517_v52 = vpop.f32.mrb[11].mxu1 }
  0xf6   :  { %423 = vst.msk [vmem:[#allocation2 + $0x98] sm:$0xff] %vm36_vm0, %v396_v42  ;;  %v518_v53 = vadd.f32 %v3169_v29, %v517_v52 }
  0xf7   :  { %550 = vst.msk [vmem:[#allocation2 + $0xd8] sm:$0xff] %vm36_vm0, %v523_v47  ;;  %422 = vst.msk [vmem:[#allocation2 + $0x90] sm:$0xff] %vm36_vm0, %v391_v48  ;;  %v3506_v54 = vpop.f32.mrb[12].mxu0  ;;  %v1173_v48 = vld [vmem:[#allocation2 + $0x8] sm:$0xff] }
  0xf8   :  { %549 = vst.msk [vmem:[#allocation2 + $0xd0] sm:$0xff] %vm36_vm0, %v518_v53  ;;  %v406_v55 = vadd.f32 %v3506_v54, %v3155_v27  ;;  %v3526_v58 = vpop.f32.mrb[12].mxu1  ;;  %v400_v59 = vpop.f32.mrb[13].mxu0  ;;  %v1182_v53 = vld [vmem:[#allocation2 + $0x48] sm:$0xff] }
  0xf9   :  { %v533_v60 = vadd.f32 %v3526_v58, %v3169_v29  ;;  %v401_v61 = vadd.f32 %v3155_v27, %v400_v59  ;;  %v527_v62 = vpop.f32.mrb[13].mxu1 }
  0xfa   :  { %425 = vst.msk [vmem:[#allocation2 + $0xa8] sm:$0xff] %vm36_vm0, %v406_v55  ;;  %v528_v63 = vadd.f32 %v3169_v29, %v527_v62  ;;  %v873_v24 = vld [vmem:[#allocation2 + $0x80] sm:$0xff] }
  0xfb   :  { %552 = vst.msk [vmem:[#allocation2 + $0xe8] sm:$0xff] %vm36_vm0, %v533_v60  ;;  %424 = vst.msk [vmem:[#allocation2 + $0xa0] sm:$0xff] %vm36_vm0, %v401_v61  ;;  %v3509_v0 = vpop.f32.mrb[14].mxu0  ;;  %v876_v20 = vld [vmem:[#allocation2 + $0xc0] sm:$0xff] }
  0xfc   :  { %551 = vst.msk [vmem:[#allocation2 + $0xe0] sm:$0xff] %vm36_vm0, %v528_v63  ;;  %v416_v1 = vadd.f32 %v3509_v0, %v3155_v27  ;;  %v3529_v2 = vpop.f32.mrb[14].mxu1  ;;  %v410_v3 = vpop.f32.mrb[15].mxu0  ;;  %v1195_v0 = vld [vmem:[#allocation2 + $0xc8] sm:$0xff] }
  0xfd   :  { %v543_v4 = vadd.f32 %v3529_v2, %v3169_v29  ;;  %v411_v5 = vadd.f32 %v3155_v27, %v410_v3  ;;  %v537_v6 = vpop.f32.mrb[15].mxu1 }
  0xfe   :  { %427 = vst.msk [vmem:[#allocation2 + $0xb8] sm:$0xff] %vm36_vm0, %v416_v1  ;;  %v538_v7 = vadd.f32 %v3169_v29, %v537_v6 }
  0xff   :  { %554 = vst.msk [vmem:[#allocation2 + $0xf8] sm:$0xff] %vm36_vm0, %v543_v4  ;;  %426 = vst.msk [vmem:[#allocation2 + $0xb0] sm:$0xff] %vm36_vm0, %v411_v5  ;;  %v628_v8 = vpop.f32.mrb[16].mxu0  ;;  %v1191_v4 = vld [vmem:[#allocation2 + $0x88] sm:$0xff] }
 0x100   :  { %553 = vst.msk [vmem:[#allocation2 + $0xf0] sm:$0xff] %vm36_vm0, %v538_v7  ;;  %v858_v10 = vadd.f32 %v857_v9, %v628_v8  ;;  %v703_v11 = vpop.f32.mrb[16].mxu1  ;;  %v3540_v13 = vpop.f32.mrb[17].mxu0 }
 0x101   :  { %v866_v14 = vadd.f32 %v865_v12, %v703_v11  ;;  %v3551_v15 = vpop.f32.mrb[17].mxu1 }
 0x102   :  { %v3190_v16 = vmul.f32 -1.442695, %v858_v10 }
 0x103   :  { %v3191_v17 = vmul.f32 -1.442695, %v866_v14 }
 0x104   :  { %4109 = vpow2.f32 %v3190_v16 }
 0x105   :  { %4111 = vpow2.f32 %v3191_v17 }
 0x107   :  { %v778_v18 = vpop.f32.mrb[18].mxu0 }
 0x108   :  { %v853_v19 = vpop.f32.mrb[18].mxu1  ;;  %v3562_v21 = vpop.f32.mrb[19].mxu0  ;;  %v874_v26 = vadd.f32 %v873_v24, %v778_v18 }
 0x109   :  { %v877_v22 = vadd.f32 %v876_v20, %v853_v19  ;;  %v3573_v23 = vpop.f32.mrb[19].mxu1 }
 0x10a   :  { %v1492_v23 = vld [vmem:[#allocation2 + $0x10] sm:$0xff] }
 0x10b   :  { %v3192_v25 = vmul.f32 -1.442695, %v877_v22 }
 0x10d   :  { %4113 = vpow2.f32 %v3192_v25  ;;  %v1501_v25 = vld [vmem:[#allocation2 + $0x50] sm:$0xff] }
 0x10e   :  { %v4110_v27 = vpop.eup %4109  ;;  %4115 = vtanh.f32 %v874_v26 }
 0x10f   :  { %v4112_v28 = vpop.eup %4111  ;;  %v862_v29 = vadd.f32 1.0, %v4110_v27 }
 0x110   :  { %v870_v30 = vadd.f32 1.0, %v4112_v28 }
 0x111   :  { %4117 = vrcp.f32 %v862_v29 }
 0x112   :  { %4119 = vrcp.f32 %v870_v30 }
 0x117   :  { %v4114_v32 = vpop.eup %4113 }
 0x118   :  { %v4116_v33 = vpop.eup %4115  ;;  %v881_v39 = vadd.f32 1.0, %v4114_v32 }
 0x11a   :  { %4121 = vrcp.f32 %v881_v39 }
 0x11b   :  { %v4118_v34 = vpop.eup %4117 }
 0x11c   :  { %v4120_v35 = vpop.eup %4119  ;;  %v885_v36 = vmul.f32 %v4118_v34, %v4116_v33 }
 0x11d   :  { %v884_v40 = vmul.f32 0.0, %v4120_v35  ;;  %v1514_v35 = vld [vmem:[#allocation2 + $0xd0] sm:$0xff] }
 0x11f   :  { %v4525_v41 = vadd.f32 %v885_v36, %v884_v40 }
 0x121   :  { %4123 = vtanh.f32 %v4525_v41 }
 0x124   :  { %v4122_v42 = vpop.eup %4121 }
 0x12b   :  { %v4124_v45 = vpop.eup %4123 }
 0x12c   :  { %v888_v46 = vmul.f32 %v4124_v45, %v4122_v42 }
 0x12e   :  { %3583 = vmatmul.mubr.msk.f32.vlgmr.msra.gmra.mrb[20].mxu0 %vm36_vm0, %v888_v46  ;;  %3594 = vmatmul.mubr.msk.f32.vlgmr.msra.gmra.mrb[20].mxu1 %vm36_vm0, %v888_v46 }
 0x12f   :  { %3952 = vmatpush3.bf16.msra.mxu0 %v4431_v50  ;;  %3958 = vmatpush3.bf16.msra.mxu1 %v4435_v51 }
 0x130   :  { %3953 = vmatprep.subr.bf16.mxu0 %v4237_v31  ;;  %3959 = vmatprep.subr.bf16.mxu1 %v4237_v31 }
 0x131   :  { %3604 = vmatprep.mubr.msk.f32.mxu0 %vm4238_vm1, %v4239_v49  ;;  %3615 = vmatprep.mubr.msk.f32.mxu1 %vm4238_vm1, %v4239_v49 }
 0x133   :  { %3955 = vmatpush3.bf16.msra.mxu0 %v4452_v56  ;;  %3961 = vmatpush3.bf16.msra.mxu1 %v4456_v57 }
 0x134   :  { %3962 = vmatprep.subr.bf16.mxu0 %v4237_v31  ;;  %3968 = vmatprep.subr.bf16.mxu1 %v4237_v31 }
 0x136   :  { %3605 = vmatmul.mubr.msk.f32.vlgmr.msra.gmra.mrb[22].mxu0 %vm36_vm0, %v888_v46  ;;  %3616 = vmatmul.mubr.msk.f32.vlgmr.msra.gmra.mrb[22].mxu1 %vm36_vm0, %v888_v46 }
 0x137   :  { %3964 = vmatpush3.bf16.msra.mxu0 %v4373_v37  ;;  %3970 = vmatpush3.bf16.msra.mxu1 %v4377_v38 }
 0x138   :  { %3965 = vmatprep.subr.bf16.mxu0 %v4237_v31  ;;  %3971 = vmatprep.subr.bf16.mxu1 %v4237_v31 }
 0x139   :  { %3626 = vmatprep.mubr.msk.f32.mxu0 %vm4238_vm1, %v4239_v49  ;;  %3637 = vmatprep.mubr.msk.f32.mxu1 %vm4238_vm1, %v4239_v49 }
 0x13b   :  { %3967 = vmatpush3.bf16.msra.mxu0 %v4396_v43  ;;  %3973 = vmatpush3.bf16.msra.mxu1 %v4400_v44 }
 0x13c   :  { %3974 = vmatprep.subr.bf16.mxu0 %v4237_v31  ;;  %3980 = vmatprep.subr.bf16.mxu1 %v4237_v31 }
 0x201   :  { %v958_v47 = vpop.f32.mrb[20].mxu0  ;;  %v1028_v52 = vpop.f32.mrb[20].mxu1 }
 0x202   :  { %v1174_v54 = vadd.f32 %v1173_v48, %v958_v47  ;;  %v1183_v55 = vadd.f32 %v1182_v53, %v1028_v52  ;;  %v3584_v58 = vpop.f32.mrb[21].mxu0  ;;  %v3595_v59 = vpop.f32.mrb[21].mxu1 }
 0x204   :  { %v3197_v60 = vmul.f32 -1.442695, %v1174_v54  ;;  %v3198_v61 = vmul.f32 -1.442695, %v1183_v55 }
 0x206   :  { %4125 = vpow2.f32 %v3197_v60 }
 0x207   :  { %4127 = vpow2.f32 %v3198_v61 }
 0x209   :  { %v1098_v62 = vpop.f32.mrb[22].mxu0  ;;  %v1168_v63 = vpop.f32.mrb[22].mxu1 }
 0x20a   :  { %v1196_v1 = vadd.f32 %v1195_v0, %v1168_v63  ;;  %v3606_v2 = vpop.f32.mrb[23].mxu0  ;;  %v3617_v3 = vpop.f32.mrb[23].mxu1  ;;  %v1192_v6 = vadd.f32 %v1191_v4, %v1098_v62 }
 0x20b   :  { %v1811_v3 = vld [vmem:[#allocation2 + $0x18] sm:$0xff] }
 0x20c   :  { %v3199_v5 = vmul.f32 -1.442695, %v1196_v1 }
 0x20e   :  { %4129 = vpow2.f32 %v3199_v5  ;;  %v1820_v5 = vld [vmem:[#allocation2 + $0x58] sm:$0xff] }
 0x20f   :  { %4131 = vtanh.f32 %v1192_v6 }
 0x210   :  { %v4126_v7 = vpop.eup %4125 }
 0x211   :  { %v4128_v8 = vpop.eup %4127  ;;  %v1178_v9 = vadd.f32 1.0, %v4126_v7 }
 0x212   :  { %v1187_v10 = vadd.f32 1.0, %v4128_v8 }
 0x213   :  { %4133 = vrcp.f32 %v1178_v9 }
 0x214   :  { %4135 = vrcp.f32 %v1187_v10 }
 0x218   :  { %v4130_v11 = vpop.eup %4129 }
 0x219   :  { %v4132_v12 = vpop.eup %4131  ;;  %v1200_v16 = vadd.f32 1.0, %v4130_v11 }
 0x21b   :  { %4137 = vrcp.f32 %v1200_v16 }
 0x21d   :  { %v4134_v13 = vpop.eup %4133 }
 0x21e   :  { %v4136_v14 = vpop.eup %4135  ;;  %v1204_v15 = vmul.f32 %v4134_v13, %v4132_v12 }
 0x21f   :  { %v1203_v17 = vmul.f32 %v4136_v14, %v4525_v41  ;;  %v1510_v41 = vld [vmem:[#allocation2 + $0x90] sm:$0xff]  ;;  %v1833_v14 = vld [vmem:[#allocation2 + $0xd8] sm:$0xff] }
 0x221   :  { %v4557_v18 = vadd.f32 %v1204_v15, %v1203_v17 }
 0x223   :  { %4139 = vtanh.f32 %v4557_v18 }
 0x225   :  { %v4138_v19 = vpop.eup %4137 }
 0x22d   :  { %v4140_v20 = vpop.eup %4139 }
 0x22e   :  { %v1207_v21 = vmul.f32 %v4140_v20, %v4138_v19 }
 0x230   :  { %3627 = vmatmul.mubr.msk.f32.vlgmr.msra.gmra.mrb[24].mxu0 %vm36_vm0, %v1207_v21  ;;  %3638 = vmatmul.mubr.msk.f32.vlgmr.msra.gmra.mrb[24].mxu1 %vm36_vm0, %v1207_v21 }
 0x231   :  { %3976 = vmatpush3.bf16.msra.mxu0 %v4431_v50  ;;  %3982 = vmatpush3.bf16.msra.mxu1 %v4435_v51 }
 0x232   :  { %3977 = vmatprep.subr.bf16.mxu0 %v4237_v31  ;;  %3983 = vmatprep.subr.bf16.mxu1 %v4237_v31 }
 0x233   :  { %3648 = vmatprep.mubr.msk.f32.mxu0 %vm4238_vm1, %v4239_v49  ;;  %3659 = vmatprep.mubr.msk.f32.mxu1 %vm4238_vm1, %v4239_v49 }
 0x235   :  { %3979 = vmatpush3.bf16.msra.mxu0 %v4452_v56  ;;  %3985 = vmatpush3.bf16.msra.mxu1 %v4456_v57 }
 0x236   :  { %3986 = vmatprep.subr.bf16.mxu0 %v4237_v31  ;;  %3992 = vmatprep.subr.bf16.mxu1 %v4237_v31 }
 0x238   :  { %3649 = vmatmul.mubr.msk.f32.vlgmr.msra.gmra.mrb[26].mxu0 %vm36_vm0, %v1207_v21  ;;  %3660 = vmatmul.mubr.msk.f32.vlgmr.msra.gmra.mrb[26].mxu1 %vm36_vm0, %v1207_v21 }
 0x239   :  { %3988 = vmatpush3.bf16.msra.mxu0 %v4373_v37  ;;  %3994 = vmatpush3.bf16.msra.mxu1 %v4377_v38 }
 0x23a   :  { %3989 = vmatprep.subr.bf16.mxu0 %v4237_v31  ;;  %3995 = vmatprep.subr.bf16.mxu1 %v4237_v31 }
 0x23b   :  { %3670 = vmatprep.mubr.msk.f32.mxu0 %vm4238_vm1, %v4239_v49  ;;  %3681 = vmatprep.mubr.msk.f32.mxu1 %vm4238_vm1, %v4239_v49 }
 0x23d   :  { %3991 = vmatpush3.bf16.msra.mxu0 %v4396_v43  ;;  %3997 = vmatpush3.bf16.msra.mxu1 %v4400_v44 }
 0x23e   :  { %3998 = vmatprep.subr.bf16.mxu0 %v4237_v31  ;;  %4004 = vmatprep.subr.bf16.mxu1 %v4237_v31 }
 0x303   :  { %v1277_v22 = vpop.f32.mrb[24].mxu0  ;;  %v1347_v24 = vpop.f32.mrb[24].mxu1 }
 0x304   :  { %v1493_v26 = vadd.f32 %v1492_v23, %v1277_v22  ;;  %v1502_v27 = vadd.f32 %v1501_v25, %v1347_v24  ;;  %v3628_v28 = vpop.f32.mrb[25].mxu0  ;;  %v3639_v29 = vpop.f32.mrb[25].mxu1 }
 0x306   :  { %v3204_v30 = vmul.f32 -1.442695, %v1493_v26  ;;  %v3205_v32 = vmul.f32 -1.442695, %v1502_v27 }
 0x308   :  { %4141 = vpow2.f32 %v3204_v30 }
 0x309   :  { %4143 = vpow2.f32 %v3205_v32 }
 0x30b   :  { %v1417_v33 = vpop.f32.mrb[26].mxu0  ;;  %v1487_v34 = vpop.f32.mrb[26].mxu1 }
 0x30c   :  { %v1515_v36 = vadd.f32 %v1514_v35, %v1487_v34  ;;  %v3650_v39 = vpop.f32.mrb[27].mxu0  ;;  %v3661_v40 = vpop.f32.mrb[27].mxu1  ;;  %v1511_v45 = vadd.f32 %v1510_v41, %v1417_v33 }
 0x30d   :  { %v2130_v40 = vld [vmem:[#allocation2 + $0x20] sm:$0xff] }
 0x30e   :  { %v3206_v42 = vmul.f32 -1.442695, %v1515_v36 }
 0x310   :  { %4145 = vpow2.f32 %v3206_v42  ;;  %v2139_v42 = vld [vmem:[#allocation2 + $0x60] sm:$0xff] }
 0x311   :  { %4147 = vtanh.f32 %v1511_v45 }
 0x312   :  { %v4142_v46 = vpop.eup %4141 }
 0x313   :  { %v4144_v47 = vpop.eup %4143  ;;  %v1497_v48 = vadd.f32 1.0, %v4142_v46 }
 0x314   :  { %v1506_v52 = vadd.f32 1.0, %v4144_v47 }
 0x315   :  { %4149 = vrcp.f32 %v1497_v48 }
 0x316   :  { %4151 = vrcp.f32 %v1506_v52 }
 0x31a   :  { %v4146_v53 = vpop.eup %4145 }
 0x31b   :  { %v4148_v54 = vpop.eup %4147  ;;  %v1519_v60 = vadd.f32 1.0, %v4146_v53 }
 0x31d   :  { %4153 = vrcp.f32 %v1519_v60 }
 0x31f   :  { %v4150_v55 = vpop.eup %4149 }
 0x320   :  { %v4152_v58 = vpop.eup %4151  ;;  %v1523_v59 = vmul.f32 %v4150_v55, %v4148_v54 }
 0x321   :  { %v1522_v61 = vmul.f32 %v4152_v58, %v4557_v18  ;;  %v1829_v18 = vld [vmem:[#allocation2 + $0x98] sm:$0xff]  ;;  %v2152_v58 = vld [vmem:[#allocation2 + $0xe0] sm:$0xff] }
 0x323   :  { %v4589_v62 = vadd.f32 %v1523_v59, %v1522_v61 }
 0x325   :  { %4155 = vtanh.f32 %v4589_v62 }
 0x327   :  { %v4154_v63 = vpop.eup %4153 }
 0x32f   :  { %v4156_v0 = vpop.eup %4155 }
 0x330   :  { %v1526_v1 = vmul.f32 %v4156_v0, %v4154_v63 }
 0x332   :  { %3671 = vmatmul.mubr.msk.f32.vlgmr.msra.gmra.mrb[28].mxu0 %vm36_vm0, %v1526_v1  ;;  %3682 = vmatmul.mubr.msk.f32.vlgmr.msra.gmra.mrb[28].mxu1 %vm36_vm0, %v1526_v1 }
 0x333   :  { %4000 = vmatpush3.bf16.msra.mxu0 %v4431_v50  ;;  %4006 = vmatpush3.bf16.msra.mxu1 %v4435_v51 }
 0x334   :  { %4001 = vmatprep.subr.bf16.mxu0 %v4237_v31  ;;  %4007 = vmatprep.subr.bf16.mxu1 %v4237_v31 }
 0x335   :  { %3692 = vmatprep.mubr.msk.f32.mxu0 %vm4238_vm1, %v4239_v49  ;;  %3703 = vmatprep.mubr.msk.f32.mxu1 %vm4238_vm1, %v4239_v49 }
 0x337   :  { %4003 = vmatpush3.bf16.msra.mxu0 %v4452_v56  ;;  %4009 = vmatpush3.bf16.msra.mxu1 %v4456_v57 }
 0x338   :  { %4010 = vmatprep.subr.bf16.mxu0 %v4237_v31  ;;  %4016 = vmatprep.subr.bf16.mxu1 %v4237_v31 }
 0x33a   :  { %3693 = vmatmul.mubr.msk.f32.vlgmr.msra.gmra.mrb[30].mxu0 %vm36_vm0, %v1526_v1  ;;  %3704 = vmatmul.mubr.msk.f32.vlgmr.msra.gmra.mrb[30].mxu1 %vm36_vm0, %v1526_v1 }
 0x33b   :  { %4012 = vmatpush3.bf16.msra.mxu0 %v4373_v37  ;;  %4018 = vmatpush3.bf16.msra.mxu1 %v4377_v38 }
 0x33c   :  { %4013 = vmatprep.subr.bf16.mxu0 %v4237_v31  ;;  %4019 = vmatprep.subr.bf16.mxu1 %v4237_v31 }
 0x33d   :  { %3714 = vmatprep.mubr.msk.f32.mxu0 %vm4238_vm1, %v4239_v49  ;;  %3725 = vmatprep.mubr.msk.f32.mxu1 %vm4238_vm1, %v4239_v49 }
 0x33f   :  { %4015 = vmatpush3.bf16.msra.mxu0 %v4396_v43  ;;  %4021 = vmatpush3.bf16.msra.mxu1 %v4400_v44 }
 0x340   :  { %4022 = vmatprep.subr.bf16.mxu0 %v4237_v31  ;;  %4028 = vmatprep.subr.bf16.mxu1 %v4237_v31 }
 0x405   :  { %v1596_v2 = vpop.f32.mrb[28].mxu0  ;;  %v1666_v4 = vpop.f32.mrb[28].mxu1 }
 0x406   :  { %v1812_v6 = vadd.f32 %v1811_v3, %v1596_v2  ;;  %v1821_v7 = vadd.f32 %v1820_v5, %v1666_v4  ;;  %v3672_v8 = vpop.f32.mrb[29].mxu0  ;;  %v3683_v9 = vpop.f32.mrb[29].mxu1 }
 0x408   :  { %v3211_v10 = vmul.f32 -1.442695, %v1812_v6  ;;  %v3212_v11 = vmul.f32 -1.442695, %v1821_v7 }
 0x40a   :  { %4157 = vpow2.f32 %v3211_v10 }
 0x40b   :  { %4159 = vpow2.f32 %v3212_v11 }
 0x40d   :  { %v1736_v12 = vpop.f32.mrb[30].mxu0  ;;  %v1806_v13 = vpop.f32.mrb[30].mxu1 }
 0x40e   :  { %v1834_v15 = vadd.f32 %v1833_v14, %v1806_v13  ;;  %v3694_v16 = vpop.f32.mrb[31].mxu0  ;;  %v3705_v17 = vpop.f32.mrb[31].mxu1  ;;  %v1830_v20 = vadd.f32 %v1829_v18, %v1736_v12 }
 0x40f   :  { %v2449_v17 = vld [vmem:[#allocation2 + $0x28] sm:$0xff] }
 0x410   :  { %v3213_v19 = vmul.f32 -1.442695, %v1834_v15 }
 0x412   :  { %4161 = vpow2.f32 %v3213_v19  ;;  %v2458_v19 = vld [vmem:[#allocation2 + $0x68] sm:$0xff] }
 0x413   :  { %4163 = vtanh.f32 %v1830_v20 }
 0x414   :  { %v4158_v21 = vpop.eup %4157 }
 0x415   :  { %v4160_v22 = vpop.eup %4159  ;;  %v1816_v23 = vadd.f32 1.0, %v4158_v21 }
 0x416   :  { %v1825_v24 = vadd.f32 1.0, %v4160_v22 }
 0x417   :  { %4165 = vrcp.f32 %v1816_v23 }
 0x418   :  { %4167 = vrcp.f32 %v1825_v24 }
 0x41c   :  { %v4162_v25 = vpop.eup %4161 }
 0x41d   :  { %v4164_v26 = vpop.eup %4163  ;;  %v1838_v30 = vadd.f32 1.0, %v4162_v25 }
 0x41f   :  { %4169 = vrcp.f32 %v1838_v30 }
 0x421   :  { %v4166_v27 = vpop.eup %4165 }
 0x422   :  { %v4168_v28 = vpop.eup %4167  ;;  %v1842_v29 = vmul.f32 %v4166_v27, %v4164_v26 }
 0x423   :  { %v1841_v32 = vmul.f32 %v4168_v28, %v4589_v62  ;;  %v2148_v62 = vld [vmem:[#allocation2 + $0xa0] sm:$0xff]  ;;  %v2471_v28 = vld [vmem:[#allocation2 + $0xe8] sm:$0xff] }
 0x425   :  { %v4621_v33 = vadd.f32 %v1842_v29, %v1841_v32 }
 0x427   :  { %4171 = vtanh.f32 %v4621_v33 }
 0x429   :  { %v4170_v34 = vpop.eup %4169 }
 0x431   :  { %v4172_v35 = vpop.eup %4171 }
 0x432   :  { %v1845_v36 = vmul.f32 %v4172_v35, %v4170_v34 }
 0x434   :  { %3715 = vmatmul.mubr.msk.f32.vlgmr.msra.gmra.mrb[32].mxu0 %vm36_vm0, %v1845_v36  ;;  %3726 = vmatmul.mubr.msk.f32.vlgmr.msra.gmra.mrb[32].mxu1 %vm36_vm0, %v1845_v36 }
 0x435   :  { %4024 = vmatpush3.bf16.msra.mxu0 %v4431_v50  ;;  %4030 = vmatpush3.bf16.msra.mxu1 %v4435_v51 }
 0x436   :  { %4025 = vmatprep.subr.bf16.mxu0 %v4237_v31  ;;  %4031 = vmatprep.subr.bf16.mxu1 %v4237_v31 }
 0x437   :  { %3736 = vmatprep.mubr.msk.f32.mxu0 %vm4238_vm1, %v4239_v49  ;;  %3747 = vmatprep.mubr.msk.f32.mxu1 %vm4238_vm1, %v4239_v49 }
 0x439   :  { %4027 = vmatpush3.bf16.msra.mxu0 %v4452_v56  ;;  %4033 = vmatpush3.bf16.msra.mxu1 %v4456_v57 }
 0x43a   :  { %4034 = vmatprep.subr.bf16.mxu0 %v4237_v31  ;;  %4040 = vmatprep.subr.bf16.mxu1 %v4237_v31 }
 0x43c   :  { %3737 = vmatmul.mubr.msk.f32.vlgmr.msra.gmra.mrb[34].mxu0 %vm36_vm0, %v1845_v36  ;;  %3748 = vmatmul.mubr.msk.f32.vlgmr.msra.gmra.mrb[34].mxu1 %vm36_vm0, %v1845_v36 }
 0x43d   :  { %4036 = vmatpush3.bf16.msra.mxu0 %v4373_v37  ;;  %4042 = vmatpush3.bf16.msra.mxu1 %v4377_v38 }
 0x43e   :  { %4037 = vmatprep.subr.bf16.mxu0 %v4237_v31  ;;  %4043 = vmatprep.subr.bf16.mxu1 %v4237_v31 }
 0x43f   :  { %3758 = vmatprep.mubr.msk.f32.mxu0 %vm4238_vm1, %v4239_v49  ;;  %3769 = vmatprep.mubr.msk.f32.mxu1 %vm4238_vm1, %v4239_v49 }
 0x441   :  { %4039 = vmatpush3.bf16.msra.mxu0 %v4396_v43  ;;  %4045 = vmatpush3.bf16.msra.mxu1 %v4400_v44 }
 0x442   :  { %4046 = vmatprep.subr.bf16.mxu0 %v4237_v31  ;;  %4052 = vmatprep.subr.bf16.mxu1 %v4237_v31 }
 0x507   :  { %v1915_v39 = vpop.f32.mrb[32].mxu0  ;;  %v1985_v41 = vpop.f32.mrb[32].mxu1 }
 0x508   :  { %v2131_v45 = vadd.f32 %v2130_v40, %v1915_v39  ;;  %v2140_v46 = vadd.f32 %v2139_v42, %v1985_v41  ;;  %v3716_v47 = vpop.f32.mrb[33].mxu0  ;;  %v3727_v48 = vpop.f32.mrb[33].mxu1 }
 0x50a   :  { %v3218_v52 = vmul.f32 -1.442695, %v2131_v45  ;;  %v3219_v53 = vmul.f32 -1.442695, %v2140_v46 }
 0x50c   :  { %4173 = vpow2.f32 %v3218_v52 }
 0x50d   :  { %4175 = vpow2.f32 %v3219_v53 }
 0x50f   :  { %v2055_v54 = vpop.f32.mrb[34].mxu0  ;;  %v2125_v55 = vpop.f32.mrb[34].mxu1 }
 0x510   :  { %v2153_v59 = vadd.f32 %v2152_v58, %v2125_v55  ;;  %v3738_v60 = vpop.f32.mrb[35].mxu0  ;;  %v3749_v61 = vpop.f32.mrb[35].mxu1  ;;  %v2149_v0 = vadd.f32 %v2148_v62, %v2055_v54 }
 0x511   :  { %v2777_v61 = vld [vmem:[#allocation2 + $0x70] sm:$0xff] }
 0x512   :  { %v3220_v63 = vmul.f32 -1.442695, %v2153_v59 }
 0x514   :  { %4177 = vpow2.f32 %v3220_v63 }
 0x515   :  { %4179 = vtanh.f32 %v2149_v0 }
 0x516   :  { %v4174_v1 = vpop.eup %4173 }
 0x517   :  { %v4176_v2 = vpop.eup %4175  ;;  %v2135_v3 = vadd.f32 1.0, %v4174_v1 }
 0x518   :  { %v2144_v4 = vadd.f32 1.0, %v4176_v2 }
 0x519   :  { %4181 = vrcp.f32 %v2135_v3 }
 0x51a   :  { %4183 = vrcp.f32 %v2144_v4 }
 0x51e   :  { %v4178_v5 = vpop.eup %4177 }
 0x51f   :  { %v4180_v6 = vpop.eup %4179  ;;  %v2157_v10 = vadd.f32 1.0, %v4178_v5  ;;  %v2790_v5 = vld [vmem:[#allocation2 + $0xf0] sm:$0xff] }
 0x521   :  { %4185 = vrcp.f32 %v2157_v10 }
 0x523   :  { %v4182_v7 = vpop.eup %4181 }
 0x524   :  { %v4184_v8 = vpop.eup %4183  ;;  %v2161_v9 = vmul.f32 %v4182_v7, %v4180_v6 }
 0x525   :  { %v2160_v11 = vmul.f32 %v4184_v8, %v4621_v33  ;;  %v2467_v33 = vld [vmem:[#allocation2 + $0xa8] sm:$0xff]  ;;  %v2786_v8 = vld [vmem:[#allocation2 + $0xb0] sm:$0xff] }
 0x527   :  { %v4653_v12 = vadd.f32 %v2161_v9, %v2160_v11 }
 0x529   :  { %4187 = vtanh.f32 %v4653_v12 }
 0x52b   :  { %v4186_v13 = vpop.eup %4185 }
 0x533   :  { %v4188_v14 = vpop.eup %4187 }
 0x534   :  { %v2164_v15 = vmul.f32 %v4188_v14, %v4186_v13 }
 0x536   :  { %3759 = vmatmul.mubr.msk.f32.vlgmr.msra.gmra.mrb[36].mxu0 %vm36_vm0, %v2164_v15  ;;  %3770 = vmatmul.mubr.msk.f32.vlgmr.msra.gmra.mrb[36].mxu1 %vm36_vm0, %v2164_v15 }
 0x537   :  { %4048 = vmatpush3.bf16.msra.mxu0 %v4431_v50  ;;  %4054 = vmatpush3.bf16.msra.mxu1 %v4435_v51 }
 0x538   :  { %4049 = vmatprep.subr.bf16.mxu0 %v4237_v31  ;;  %4055 = vmatprep.subr.bf16.mxu1 %v4237_v31 }
 0x539   :  { %3780 = vmatprep.mubr.msk.f32.mxu0 %vm4238_vm1, %v4239_v49  ;;  %3791 = vmatprep.mubr.msk.f32.mxu1 %vm4238_vm1, %v4239_v49 }
 0x53b   :  { %4051 = vmatpush3.bf16.msra.mxu0 %v4452_v56  ;;  %4057 = vmatpush3.bf16.msra.mxu1 %v4456_v57 }
 0x53c   :  { %4058 = vmatprep.subr.bf16.mxu0 %v4237_v31  ;;  %4064 = vmatprep.subr.bf16.mxu1 %v4237_v31 }
 0x53e   :  { %3781 = vmatmul.mubr.msk.f32.vlgmr.msra.gmra.mrb[38].mxu0 %vm36_vm0, %v2164_v15  ;;  %3792 = vmatmul.mubr.msk.f32.vlgmr.msra.gmra.mrb[38].mxu1 %vm36_vm0, %v2164_v15 }
 0x53f   :  { %4060 = vmatpush3.bf16.msra.mxu0 %v4373_v37  ;;  %4066 = vmatpush3.bf16.msra.mxu1 %v4377_v38 }
 0x540   :  { %4061 = vmatprep.subr.bf16.mxu0 %v4237_v31  ;;  %4067 = vmatprep.subr.bf16.mxu1 %v4237_v31 }
 0x541   :  { %3802 = vmatprep.mubr.msk.f32.mxu0 %vm4238_vm1, %v4239_v49  ;;  %3813 = vmatprep.mubr.msk.f32.mxu1 %vm4238_vm1, %v4239_v49 }
 0x543   :  { %4063 = vmatpush3.bf16.msra.mxu0 %v4396_v43  ;;  %4069 = vmatpush3.bf16.msra.mxu1 %v4400_v44 }
 0x544   :  { %4070 = vmatprep.subr.bf16.mxu0 %v4237_v31  ;;  %4076 = vmatprep.subr.bf16.mxu1 %v4237_v31 }
 0x609   :  { %v2234_v16 = vpop.f32.mrb[36].mxu0  ;;  %v2304_v18 = vpop.f32.mrb[36].mxu1 }
 0x60a   :  { %v2450_v20 = vadd.f32 %v2449_v17, %v2234_v16  ;;  %v2459_v21 = vadd.f32 %v2458_v19, %v2304_v18  ;;  %v3760_v22 = vpop.f32.mrb[37].mxu0  ;;  %v3771_v23 = vpop.f32.mrb[37].mxu1 }
 0x60c   :  { %v3225_v24 = vmul.f32 -1.442695, %v2450_v20  ;;  %v3226_v25 = vmul.f32 -1.442695, %v2459_v21 }
 0x60e   :  { %4189 = vpow2.f32 %v3225_v24 }
 0x60f   :  { %4191 = vpow2.f32 %v3226_v25 }
 0x611   :  { %v2374_v26 = vpop.f32.mrb[38].mxu0  ;;  %v2444_v27 = vpop.f32.mrb[38].mxu1 }
 0x612   :  { %v2472_v29 = vadd.f32 %v2471_v28, %v2444_v27  ;;  %v3782_v30 = vpop.f32.mrb[39].mxu0  ;;  %v3793_v32 = vpop.f32.mrb[39].mxu1  ;;  %v2468_v35 = vadd.f32 %v2467_v33, %v2374_v26  ;;  %v3096_v27 = vld [vmem:[#allocation2 + $0x78] sm:$0xff] }
 0x614   :  { %v3227_v34 = vmul.f32 -1.442695, %v2472_v29 }
 0x616   :  { %4193 = vpow2.f32 %v3227_v34  ;;  %v3109_v34 = vld [vmem:[#allocation2 + $0xf8] sm:$0xff] }
 0x617   :  { %4195 = vtanh.f32 %v2468_v35 }
 0x618   :  { %v4190_v36 = vpop.eup %4189 }
 0x619   :  { %v4192_v39 = vpop.eup %4191  ;;  %v2454_v40 = vadd.f32 1.0, %v4190_v36 }
 0x61a   :  { %v2463_v41 = vadd.f32 1.0, %v4192_v39  ;;  %v3105_v39 = vld [vmem:[#allocation2 + $0xb8] sm:$0xff] }
 0x61b   :  { %4197 = vrcp.f32 %v2454_v40 }
 0x61c   :  { %4199 = vrcp.f32 %v2463_v41 }
 0x620   :  { %v4194_v42 = vpop.eup %4193 }
 0x621   :  { %v4196_v45 = vpop.eup %4195  ;;  %v2476_v52 = vadd.f32 1.0, %v4194_v42 }
 0x623   :  { %4201 = vrcp.f32 %v2476_v52 }
 0x625   :  { %v4198_v46 = vpop.eup %4197 }
 0x626   :  { %v4200_v47 = vpop.eup %4199  ;;  %v2480_v48 = vmul.f32 %v4198_v46, %v4196_v45 }
 0x627   :  { %v2479_v53 = vmul.f32 %v4200_v47, %v4653_v12 }
 0x629   :  { %v4685_v54 = vadd.f32 %v2480_v48, %v2479_v53 }
 0x62b   :  { %4203 = vtanh.f32 %v4685_v54 }
 0x62d   :  { %v4202_v55 = vpop.eup %4201 }
 0x635   :  { %v4204_v58 = vpop.eup %4203 }
 0x636   :  { %v2483_v59 = vmul.f32 %v4204_v58, %v4202_v55 }
 0x638   :  { %3803 = vmatmul.mubr.msk.f32.vlgmr.msra.gmra.mrb[40].mxu0 %vm36_vm0, %v2483_v59  ;;  %3814 = vmatmul.mubr.msk.f32.vlgmr.msra.gmra.mrb[40].mxu1 %vm36_vm0, %v2483_v59 }
 0x639   :  { %4072 = vmatpush3.bf16.msra.mxu0 %v4431_v50  ;;  %4078 = vmatpush3.bf16.msra.mxu1 %v4435_v51 }
 0x63a   :  { %4073 = vmatprep.subr.bf16.mxu0 %v4237_v31  ;;  %4079 = vmatprep.subr.bf16.mxu1 %v4237_v31 }
 0x63b   :  { %3824 = vmatprep.mubr.msk.f32.mxu0 %vm4238_vm1, %v4239_v49  ;;  %3835 = vmatprep.mubr.msk.f32.mxu1 %vm4238_vm1, %v4239_v49 }
 0x63d   :  { %4075 = vmatpush3.bf16.msra.mxu0 %v4452_v56  ;;  %4081 = vmatpush3.bf16.msra.mxu1 %v4456_v57 }
 0x63e   :  { %4082 = vmatprep.subr.bf16.mxu0 %v4237_v31  ;;  %4088 = vmatprep.subr.bf16.mxu1 %v4237_v31 }
 0x640   :  { %3825 = vmatmul.mubr.msk.f32.vlgmr.msra.gmra.mrb[42].mxu0 %vm36_vm0, %v2483_v59  ;;  %3836 = vmatmul.mubr.msk.f32.vlgmr.msra.gmra.mrb[42].mxu1 %vm36_vm0, %v2483_v59 }
 0x641   :  { %4084 = vmatpush3.bf16.msra.mxu0 %v4373_v37  ;;  %4090 = vmatpush3.bf16.msra.mxu1 %v4377_v38  ;;  %v2768_v38 = vld [vmem:[#allocation2 + $0x30] sm:$0xff] }
 0x642   :  { %4085 = vmatprep.subr.bf16.mxu0 %v4237_v31  ;;  %4091 = vmatprep.subr.bf16.mxu1 %v4237_v31 }
 0x643   :  { %3846 = vmatprep.mubr.msk.f32.mxu0 %vm4238_vm1, %v4239_v49  ;;  %3857 = vmatprep.mubr.msk.f32.mxu1 %vm4238_vm1, %v4239_v49 }
 0x645   :  { %4087 = vmatpush3.bf16.msra.mxu0 %v4396_v43  ;;  %4093 = vmatpush3.bf16.msra.mxu1 %v4400_v44 }
 0x646   :  { %4094 = vmatprep.subr.bf16.mxu0 %v4237_v31  ;;  %4100 = vmatprep.subr.bf16.mxu1 %v4237_v31 }
 0x70b   :  { %v2553_v37 = vpop.f32.mrb[40].mxu0  ;;  %v2623_v60 = vpop.f32.mrb[40].mxu1 }
 0x70c   :  { %v2769_v62 = vadd.f32 %v2768_v38, %v2553_v37  ;;  %v2778_v63 = vadd.f32 %v2777_v61, %v2623_v60  ;;  %v3804_v0 = vpop.f32.mrb[41].mxu0  ;;  %v3815_v1 = vpop.f32.mrb[41].mxu1 }
 0x70e   :  { %v3232_v2 = vmul.f32 -1.442695, %v2769_v62  ;;  %v3233_v3 = vmul.f32 -1.442695, %v2778_v63 }
 0x710   :  { %4205 = vpow2.f32 %v3232_v2 }
 0x711   :  { %4207 = vpow2.f32 %v3233_v3 }
 0x713   :  { %v2693_v4 = vpop.f32.mrb[42].mxu0  ;;  %v2763_v43 = vpop.f32.mrb[42].mxu1 }
 0x714   :  { %v2791_v44 = vadd.f32 %v2790_v5, %v2763_v43  ;;  %v3826_v6 = vpop.f32.mrb[43].mxu0  ;;  %v3837_v7 = vpop.f32.mrb[43].mxu1  ;;  %v2787_v10 = vadd.f32 %v2786_v8, %v2693_v4 }
 0x716   :  { %v3234_v9 = vmul.f32 -1.442695, %v2791_v44 }
 0x718   :  { %4209 = vpow2.f32 %v3234_v9 }
 0x719   :  { %4211 = vtanh.f32 %v2787_v10 }
 0x71a   :  { %v4206_v11 = vpop.eup %4205 }
 0x71b   :  { %v4208_v12 = vpop.eup %4207  ;;  %v2773_v13 = vadd.f32 1.0, %v4206_v11 }
 0x71c   :  { %v2782_v14 = vadd.f32 1.0, %v4208_v12 }
 0x71d   :  { %4213 = vrcp.f32 %v2773_v13 }
 0x71e   :  { %4215 = vrcp.f32 %v2782_v14 }
 0x722   :  { %v4210_v15 = vpop.eup %4209 }
 0x723   :  { %v4212_v16 = vpop.eup %4211  ;;  %v2795_v20 = vadd.f32 1.0, %v4210_v15 }
 0x725   :  { %4217 = vrcp.f32 %v2795_v20 }
 0x727   :  { %v4214_v17 = vpop.eup %4213 }
 0x728   :  { %v4216_v18 = vpop.eup %4215  ;;  %v2799_v19 = vmul.f32 %v4214_v17, %v4212_v16 }
 0x729   :  { %v2798_v21 = vmul.f32 %v4216_v18, %v4685_v54 }
 0x72b   :  { %v2800_v22 = vadd.f32 %v2799_v19, %v2798_v21 }
 0x72d   :  { %4219 = vtanh.f32 %v2800_v22 }
 0x72f   :  { %v4218_v23 = vpop.eup %4217 }
 0x737   :  { %v4220_v24 = vpop.eup %4219 }
 0x738   :  { %v2802_v25 = vmul.f32 %v4220_v24, %v4218_v23 }
 0x73a   :  { %3847 = vmatmul.mubr.msk.f32.vlgmr.msra.gmra.mrb[44].mxu0 %vm36_vm0, %v2802_v25  ;;  %3858 = vmatmul.mubr.msk.f32.vlgmr.msra.gmra.mrb[44].mxu1 %vm36_vm0, %v2802_v25 }
 0x73b   :  { %4096 = vmatpush3.bf16.msra.mxu0 %v4431_v50  ;;  %4102 = vmatpush3.bf16.msra.mxu1 %v4435_v51  ;;  %v3087_v51 = vld [vmem:[#allocation2 + $0x38] sm:$0xff] }
 0x73c   :  { %4097 = vmatprep.subr.bf16.mxu0 %v4237_v31  ;;  %4103 = vmatprep.subr.bf16.mxu1 %v4237_v31 }
 0x73d   :  { %3868 = vmatprep.mubr.msk.f32.mxu0 %vm4238_vm1, %v4239_v49  ;;  %3879 = vmatprep.mubr.msk.f32.mxu1 %vm4238_vm1, %v4239_v49 }
 0x73f   :  { %4099 = vmatpush3.bf16.msra.mxu0 %v4452_v56  ;;  %4105 = vmatpush3.bf16.msra.mxu1 %v4456_v57 }
 0x742   :  { %3869 = vmatmul.mubr.msk.f32.vlgmr.msra.gmra.mrb[46].mxu0 %vm36_vm0, %v2802_v25  ;;  %3880 = vmatmul.mubr.msk.f32.vlgmr.msra.gmra.mrb[46].mxu1 %vm36_vm0, %v2802_v25 }
 0x80d   :  { %v2872_v50 = vpop.f32.mrb[44].mxu0  ;;  %v2942_v26 = vpop.f32.mrb[44].mxu1 }
 0x80e   :  { %v3088_v28 = vadd.f32 %v3087_v51, %v2872_v50  ;;  %v3097_v31 = vadd.f32 %v3096_v27, %v2942_v26  ;;  %v3848_v29 = vpop.f32.mrb[45].mxu0  ;;  %v3859_v30 = vpop.f32.mrb[45].mxu1 }
 0x810   :  { %v3239_v32 = vmul.f32 -1.442695, %v3088_v28  ;;  %v3240_v33 = vmul.f32 -1.442695, %v3097_v31 }
 0x812   :  { %4221 = vpow2.f32 %v3239_v32 }
 0x813   :  { %4223 = vpow2.f32 %v3240_v33 }
 0x815   :  { %v3012_v49 = vpop.f32.mrb[46].mxu0  ;;  %v3082_v56 = vpop.f32.mrb[46].mxu1 }
 0x816   :  { %v3110_v57 = vadd.f32 %v3109_v34, %v3082_v56  ;;  %v3870_v35 = vpop.f32.mrb[47].mxu0  ;;  %v3881_v36 = vpop.f32.mrb[47].mxu1  ;;  %v3106_v41 = vadd.f32 %v3105_v39, %v3012_v49 }
 0x818   :  { %v3241_v40 = vmul.f32 -1.442695, %v3110_v57 }
 0x81a   :  { %4225 = vpow2.f32 %v3241_v40 }
 0x81b   :  { %4227 = vtanh.f32 %v3106_v41 }
 0x81c   :  { %v4222_v42 = vpop.eup %4221 }
 0x81d   :  { %v4224_v45 = vpop.eup %4223  ;;  %v3092_v46 = vadd.f32 1.0, %v4222_v42 }
 0x81e   :  { %v3101_v47 = vadd.f32 1.0, %v4224_v45 }
 0x81f   :  { %4229 = vrcp.f32 %v3092_v46 }
 0x820   :  { %4231 = vrcp.f32 %v3101_v47 }
 0x824   :  { %v4226_v48 = vpop.eup %4225 }
 0x825   :  { %v4228_v52 = vpop.eup %4227  ;;  %v3114_v58 = vadd.f32 1.0, %v4226_v48 }
 0x827   :  { %4233 = vrcp.f32 %v3114_v58 }
 0x829   :  { %v4230_v53 = vpop.eup %4229 }
 0x82a   :  { %v4232_v54 = vpop.eup %4231  ;;  %v3118_v55 = vmul.f32 %v4230_v53, %v4228_v52 }
 0x82b   :  { %v3117_v59 = vmul.f32 %v4232_v54, %v2800_v22 }
 0x82d   :  { %v3119_v37 = vadd.f32 %v3118_v55, %v3117_v59 }
 0x82f   :  { %4235 = vtanh.f32 %v3119_v37 }
 0x831   :  { %v4234_v38 = vpop.eup %4233 }
 0x839   :  { %v4236_v60 = vpop.eup %4235 }
 0x83a   :  { %v3121_v61 = vmul.f32 %v4236_v60, %v4234_v38 }
 0x83c   :  { %3122 = vst.msk [vmem:[%s4739_s4] sm:$0xff] %vm36_vm0, %v3121_v61 }

</bundles_post_ra>
